<compile_context>
chip_gen: v7x
topology: tpu7x:2x2x1
jax: 0.10.0
libtpu: 0.0.40
codegen_flags: <defaults>
</compile_context>

<pallas_src>
import functools

import jax
import jax.numpy as jnp
import numpy as np
from jax.experimental import pallas as pl
from jax.experimental.pallas import tpu as pltpu

_PAD = 8   # sublane-aligned top offset of image 0 inside the halo scratch
_GAP = 8   # inter-image gap rows: keeps image slabs 8-row aligned and supplies
           # the zero rows for vertical SAME padding / image separation


# ----------------------------------------------------------------------------
# Fused Pallas kernel: 4 x (conv3x3 + folded-BN + ReLU)  +  1x1 to_logits conv
# ----------------------------------------------------------------------------
def _fused_model_kernel(x_ref, t_ref, b_ref, wl_ref, raws_ref, logits_ref,
                        xb_ref, *, N, H, W, Cin, C, L, S, MT):
    # x_ref      : (N, H, W*Cin)    input rows, lane = w*Cin + ci
    # t_ref      : (L, 3*W*C, W*C)  fused row-tap block-Toeplitz weights
    #                               (3 dy taps stacked along K; dx taps, horizontal
    #                                SAME padding and BN scale folded in)
    # b_ref      : (L, 1, W*C)      folded-BN bias, tiled across lanes
    # wl_ref     : (W*C, 128)       zero-padded block-diagonal to_logits weight
    # raws_ref   : (N, H, W*C)      backbone output, lane-dense 128-lane rows
    # logits_ref : (N, H, 128)      logits (lane-dense; wrapper slices [:, :, :W])
    # xb_ref     : (ROWS, W*C)      halo scratch; image n occupies rows
    #                               [_PAD + n*S, _PAD + n*S + H)
    WC = W * C

    # Zero the halo scratch ONCE per call (the grid is gone, so this is no longer
    # a per-step cost).  The zeros provide every image's top/bottom SAME padding,
    # the inter-image separation, and null the layer-1 lanes >= W*Cin.
    xb_ref[...] = jnp.zeros_like(xb_ref)
    for n in range(N):
        xb_ref[_PAD + n * S:_PAD + n * S + H, 0:W * Cin] = x_ref[n]

    y = None
    for l in range(L):
        if l > 0:
            for n in range(N):        # activations never leave VMEM between layers
                xb_ref[_PAD + n * S:_PAD + n * S + H, :] = y[n * S:n * S + H, :]
        # (MT, 3*WC) LHS: the three dy row taps side-by-side along K, so each
        # layer is a single MXU dot instead of 3 dots + 2 VPU adds.  The rows in
        # the inter-image gaps are zero -> their outputs are dummies we never use.
        lhs = jnp.concatenate(
            [xb_ref[_PAD + dy - 1:_PAD + dy - 1 + MT, :] for dy in range(3)],
            axis=1)
        acc = jnp.dot(lhs, t_ref[l], preferred_element_type=jnp.float32)
        y = jnp.maximum(acc + b_ref[l], 0.0)          # folded BN bias + ReLU

    # 1x1 to_logits conv as a lane-dense (WC, 128) matmul (columns >= W are zero)
    lg = jnp.dot(y, wl_ref[...], preferred_element_type=jnp.float32)
    for n in range(N):
        raws_ref[n] = y[n * S:n * S + H, :].astype(raws_ref.dtype)
        logits_ref[n] = lg[n * S:n * S + H, :].astype(logits_ref.dtype)


# ----------------------------------------------------------------------------
# One-time weight preparation (numpy, OUTSIDE the jitted per-call path)
# ----------------------------------------------------------------------------
def _build_toeplitz_np(w, scale, W, lanes_in):
    """w: (3,3,Ci,Co) HWIO conv weight; scale: (Co,) folded-BN scale.

    Returns (3*lanes_in, W*Co): the 3 dy row taps stacked along K, with the 3 dx
    taps, the horizontal SAME padding and the BN scale folded into block-Toeplitz
    blocks, so the kernel needs a single matmul per layer."""
    w = np.asarray(w, np.float32)
    scale = np.asarray(scale, np.float32)
    Ci, Co = w.shape[2], w.shape[3]
    wf = w * scale[None, None, None, :]              # fold BN scale
    T = np.zeros((3, W, Ci, W, Co), np.float32)      # [dy, wi, ci, wo, co]
    wo = np.arange(W)
    for dx in range(3):
        wi = wo + dx - 1
        ok = (wi >= 0) & (wi < W)
        # advanced (wi, wo) index pairs land on the leading axis: (n_ok, 3, Ci, Co)
        T[:, wi[ok], :, wo[ok], :] = wf[:, dx][None, :, :, :]
    T = T.reshape(3, W * Ci, W * Co)
    if W * Ci < lanes_in:                            # layer 1 (Cin < C)
        T = np.pad(T, ((0, 0), (0, lanes_in - W * Ci), (0, 0)))
    return T.reshape(3 * lanes_in, W * Co)


def _build_logits_weight_np(wl, W, C, out_lanes=128):
    """wl: (C,) 1x1-conv weight -> (W*C, out_lanes) block-diagonal matrix with
    columns >= W zero, so the in-kernel logits store is a full-lane store."""
    wl = np.asarray(wl, np.float32)
    M = np.zeros((W * C, out_lanes), np.float32)
    for wi in range(W):
        M[wi * C:(wi + 1) * C, wi] = wl
    return M


def prepare_pallas_weights(layers, wl, W):
    """Build T / B / WLp once; pass them to model_forward as ordinary inputs."""
    C = int(np.asarray(layers[0]["w"]).shape[-1])
    WC = W * C
    T = np.stack([_build_toeplitz_np(p["w"], p["scale"], W, WC) for p in layers])
    B = np.stack([np.tile(np.asarray(p["bias"], np.float32), W)[None, :]
                  for p in layers])                  # (L, 1, WC)
    WLp = _build_logits_weight_np(wl, W, C)          # (WC, 128)
    return jnp.asarray(T), jnp.asarray(B), jnp.asarray(WLp)


# ----------------------------------------------------------------------------
# Forward pass wrapper
# ----------------------------------------------------------------------------
@jax.jit
def model_forward(src_nhwc, edge_length, edge_theta, T, B, WLp):
    # TODO(synk): edge_length / edge_theta feed LineApproxBlock (the 'coords'
    # head), whose definition is not in the provided spec, so it is omitted.
    del edge_length, edge_theta

    N, H, W, Cin = src_nhwc.shape
    L, K3, WC = T.shape
    C = WC // W
    S = H + _GAP                         # per-image row stride in the halo scratch
    MT = (N - 1) * S + H                 # matmul M (valid rows + inter-image gaps)
    ROWS = _PAD + MT + _PAD

    x_rows = src_nhwc.reshape(N, H, W * Cin).astype(jnp.float32)   # lane packing

    flops = 2 * L * MT * K3 * WC + 2 * MT * WC * WLp.shape[1]
    bytes_accessed = 4 * (x_rows.size + T.size + B.size + WLp.size
                          + N * H * WC + N * H * WLp.shape[1])

    kernel = functools.partial(_fused_model_kernel,
                               N=N, H=H, W=W, Cin=Cin, C=C, L=L, S=S, MT=MT)
    vmem = pl.BlockSpec(memory_space=pltpu.MemorySpace.VMEM)
    raws_rows, logits_rows = pl.pallas_call(
        kernel,
        out_shape=(
            jax.ShapeDtypeStruct((N, H, WC), jnp.float32),
            jax.ShapeDtypeStruct((N, H, WLp.shape[1]), jnp.float32),
        ),
        in_specs=[vmem, vmem, vmem, vmem],
        out_specs=(vmem, vmem),
        scratch_shapes=[pltpu.VMEM((ROWS, WC), jnp.float32)],
        compiler_params=pltpu.CompilerParams(vmem_limit_bytes=32 * 1024 * 1024),
        cost_estimate=pl.CostEstimate(flops=flops, transcendentals=0,
                                      bytes_accessed=bytes_accessed),
    )(x_rows, T, B, WLp)

    raws = raws_rows.reshape(N, H, W, C)
    logits = logits_rows[:, :, :W][..., None]        # (N, H, W, 1) NHWC
    return {"logits": logits, "raws": raws}


# ----------------------------------------------------------------------------
# Parameter construction (deterministic, synthetic; BN folded to scale/bias)
# ----------------------------------------------------------------------------
def _fold_bn(gamma, beta, running_mean, running_var, eps=1e-5):
    scale = gamma / jnp.sqrt(running_var + eps)
    bias = beta - running_mean * scale
    return scale, bias


def _make_conv_bn_params(key, cin, cout):
    kw, kg, kb, km, kv = jax.random.split(key, 5)
    w = jax.random.normal(kw, (3, 3, cin, cout), jnp.float32) * 0.1
    gamma = jax.random.uniform(kg, (cout,), jnp.float32, 0.5, 1.5)
    beta = jax.random.normal(kb, (cout,), jnp.float32) * 0.1
    rmean = jax.random.normal(km, (cout,), jnp.float32) * 0.1
    rvar = jax.random.uniform(kv, (cout,), jnp.float32, 0.5, 1.5)
    scale, bias = _fold_bn(gamma, beta, rmean, rvar)
    return {"w": w, "scale": scale, "bias": bias}


def make_backbone_params(key, in_channels, out_channels):
    """4 conv+BN+ReLU layers: warmup DoubleConvBlock + backbones[0] DoubleConvBlock."""
    keys = jax.random.split(key, 4)
    return [
        _make_conv_bn_params(keys[0], in_channels, out_channels),
        _make_conv_bn_params(keys[1], out_channels, out_channels),
        _make_conv_bn_params(keys[2], out_channels, out_channels),
        _make_conv_bn_params(keys[3], out_channels, out_channels),
    ]


# ----------------------------------------------------------------------------
# Pure-JAX reference (for correctness check)
# ----------------------------------------------------------------------------
def model_forward_ref(src_nhwc, layers, wl):
    x = src_nhwc
    for p in layers:
        y = jax.lax.conv_general_dilated(
            x, p["w"], window_strides=(1, 1), padding="SAME",
            dimension_numbers=("NHWC", "HWIO", "NHWC"),
            precision=jax.lax.Precision.HIGHEST)
        x = jnp.maximum(y * p["scale"] + p["bias"], 0.0)
    raws = x
    logits = jnp.einsum("nhwc,c->nhw", raws, wl,
                        precision=jax.lax.Precision.HIGHEST)[..., None]
    return {"logits": logits, "raws": raws}


if __name__ == "__main__":
    key = jax.random.PRNGKey(0)
    k_in, k_par, k_log = jax.random.split(key, 3)

    # Small shapes consistent with the module: NCHW src (2, 4, 16, 16),
    # backbone out_channels = 8, to_logits -> 1 channel.
    N, Cin, H, W = 2, 4, 16, 16
    C = 8

    src_nchw = jax.random.normal(k_in, (N, Cin, H, W), jnp.float32)
    src_nhwc = jnp.transpose(src_nchw, (0, 2, 3, 1))         # glue: NCHW -> NHWC

    layers = make_backbone_params(k_par, Cin, C)
    wl = jax.random.normal(k_log, (C,), jnp.float32) * 0.1   # _to_logits 1x1 weight

    # Built once (numpy) and reused across calls -- hoisted out of the jit path.
    T, B, WLp = prepare_pallas_weights(layers, wl, W)

    edge_length = jnp.full((N,), float(W), jnp.float32)      # LineApproxBlock inputs
    edge_theta = jnp.zeros((N,), jnp.float32)

    out = model_forward(src_nhwc, edge_length, edge_theta, T, B, WLp)
    out = jax.block_until_ready(out)

    ref = model_forward_ref(src_nhwc, layers, wl)
    ref = jax.block_until_ready(ref)

    assert out["raws"].shape == (N, H, W, C), out["raws"].shape
    assert out["logits"].shape == (N, H, W, 1), out["logits"].shape
    err_raws = float(jnp.max(jnp.abs(out["raws"] - ref["raws"])))
    err_logits = float(jnp.max(jnp.abs(out["logits"] - ref["logits"])))
    assert jnp.allclose(out["raws"], ref["raws"], rtol=1e-4, atol=2e-4), err_raws
    assert jnp.allclose(out["logits"], ref["logits"], rtol=1e-4, atol=2e-4), err_logits

    print("KERNEL_OK")
</pallas_src>

<mosaic_0001>
module attributes {stable_mosaic.version = 11 : i64} {
  func.func @_fused_model_kernel(%arg0: memref<2x16x64xf32, #tpu.memory_space<vmem>>, %arg1: memref<4x384x128xf32, #tpu.memory_space<vmem>>, %arg2: memref<4x1x128xf32, #tpu.memory_space<vmem>>, %arg3: memref<128x128xf32, #tpu.memory_space<vmem>>, %arg4: memref<2x16x128xf32, #tpu.memory_space<vmem>>, %arg5: memref<2x16x128xf32, #tpu.memory_space<vmem>>, %arg6: memref<56x128xf32, #tpu.memory_space<vmem>>) attributes {dimension_semantics = [], scalar_prefetch = 0 : i64, scratch_operands = 1 : i64, tpu.core_type = #tpu.core_type<tc>} {
    %cst = arith.constant 0.000000e+00 : f32
    %0 = vector.broadcast %cst : f32 to vector<56x128xf32>
    %c0 = arith.constant 0 : index
    %c0_0 = arith.constant 0 : index
    %1 = vector.load %arg6[%c0, %c0_0] : memref<56x128xf32, #tpu.memory_space<vmem>>, vector<56x128xf32>
    tpu.vector_store %arg6[%c0, %c0_0], %0 {strides = array<i32>} : memref<56x128xf32, #tpu.memory_space<vmem>>, vector<56x128xf32>,
    %c0_1 = arith.constant 0 : index
    %c0_2 = arith.constant 0 : index
    %c0_3 = arith.constant 0 : index
    %2 = vector.load %arg0[%c0_1, %c0_2, %c0_3] : memref<2x16x64xf32, #tpu.memory_space<vmem>>, vector<1x16x64xf32>
    %3 = vector.shape_cast %2 : vector<1x16x64xf32> to vector<16x64xf32>
    %c8 = arith.constant 8 : index
    %c0_4 = arith.constant 0 : index
    %4 = vector.load %arg6[%c8, %c0_4] : memref<56x128xf32, #tpu.memory_space<vmem>>, vector<16x64xf32>
    tpu.vector_store %arg6[%c8, %c0_4], %3 {strides = array<i32>} : memref<56x128xf32, #tpu.memory_space<vmem>>, vector<16x64xf32>,
    %c1 = arith.constant 1 : index
    %c0_5 = arith.constant 0 : index
    %c0_6 = arith.constant 0 : index
    %5 = vector.load %arg0[%c1, %c0_5, %c0_6] : memref<2x16x64xf32, #tpu.memory_space<vmem>>, vector<1x16x64xf32>
    %6 = vector.shape_cast %5 : vector<1x16x64xf32> to vector<16x64xf32>
    %c32 = arith.constant 32 : index
    %c0_7 = arith.constant 0 : index
    %7 = vector.load %arg6[%c32, %c0_7] : memref<56x128xf32, #tpu.memory_space<vmem>>, vector<16x64xf32>
    tpu.vector_store %arg6[%c32, %c0_7], %6 {strides = array<i32>} : memref<56x128xf32, #tpu.memory_space<vmem>>, vector<16x64xf32>,
    %c7 = arith.constant 7 : index
    %c0_8 = arith.constant 0 : index
    %8 = vector.load %arg6[%c7, %c0_8] : memref<56x128xf32, #tpu.memory_space<vmem>>, vector<40x128xf32>
    %c8_9 = arith.constant 8 : index
    %c0_10 = arith.constant 0 : index
    %9 = vector.load %arg6[%c8_9, %c0_10] : memref<56x128xf32, #tpu.memory_space<vmem>>, vector<40x128xf32>
    %c9 = arith.constant 9 : index
    %c0_11 = arith.constant 0 : index
    %10 = vector.load %arg6[%c9, %c0_11] : memref<56x128xf32, #tpu.memory_space<vmem>>, vector<40x128xf32>
    %11 = tpu.concatenate %8, %9, %10 in 1 : vector<40x128xf32>, vector<40x128xf32>, vector<40x128xf32> -> vector<40x384xf32>
    %c0_12 = arith.constant 0 : index
    %c0_13 = arith.constant 0 : index
    %c0_14 = arith.constant 0 : index
    %12 = vector.load %arg1[%c0_12, %c0_13, %c0_14] : memref<4x384x128xf32, #tpu.memory_space<vmem>>, vector<1x384x128xf32>
    %13 = vector.shape_cast %12 : vector<1x384x128xf32> to vector<384x128xf32>
    %cst_15 = arith.constant dense<0.000000e+00> : vector<40x128xf32>
    %14 = tpu.matmul %11, %13, %cst_15 {dimension_numbers = #tpu.dot_dimension_numbers<[1], [0], [0], [1], [0, 0, 1, 1], [], []>} : vector<40x384xf32>, vector<384x128xf32>, vector<40x128xf32> -> vector<40x128xf32>
    %c0_16 = arith.constant 0 : index
    %c0_17 = arith.constant 0 : index
    %c0_18 = arith.constant 0 : index
    %15 = vector.load %arg2[%c0_16, %c0_17, %c0_18] : memref<4x1x128xf32, #tpu.memory_space<vmem>>, vector<1x1x128xf32>
    %16 = vector.shape_cast %15 : vector<1x1x128xf32> to vector<1x128xf32>
    %17 = vector.broadcast %16 : vector<1x128xf32> to vector<40x128xf32>
    %18 = arith.addf %14, %17 : vector<40x128xf32>
    %cst_19 = arith.constant 0.000000e+00 : f32
    %19 = vector.broadcast %cst_19 : f32 to vector<40x128xf32>
    %20 = arith.maximumf %18, %19 : vector<40x128xf32>
    %21 = vector.extract_strided_slice %20 {offsets = [0, 0], sizes = [16, 128], strides = [1, 1]} : vector<40x128xf32> to vector<16x128xf32>
    %c8_20 = arith.constant 8 : index
    %c0_21 = arith.constant 0 : index
    %22 = vector.load %arg6[%c8_20, %c0_21] : memref<56x128xf32, #tpu.memory_space<vmem>>, vector<16x128xf32>
    tpu.vector_store %arg6[%c8_20, %c0_21], %21 {strides = array<i32>} : memref<56x128xf32, #tpu.memory_space<vmem>>, vector<16x128xf32>,
    %23 = vector.extract_strided_slice %20 {offsets = [24, 0], sizes = [16, 128], strides = [1, 1]} : vector<40x128xf32> to vector<16x128xf32>
    %c32_22 = arith.constant 32 : index
    %c0_23 = arith.constant 0 : index
    %24 = vector.load %arg6[%c32_22, %c0_23] : memref<56x128xf32, #tpu.memory_space<vmem>>, vector<16x128xf32>
    tpu.vector_store %arg6[%c32_22, %c0_23], %23 {strides = array<i32>} : memref<56x128xf32, #tpu.memory_space<vmem>>, vector<16x128xf32>,
    %c7_24 = arith.constant 7 : index
    %c0_25 = arith.constant 0 : index
    %25 = vector.load %arg6[%c7_24, %c0_25] : memref<56x128xf32, #tpu.memory_space<vmem>>, vector<40x128xf32>
    %c8_26 = arith.constant 8 : index
    %c0_27 = arith.constant 0 : index
    %26 = vector.load %arg6[%c8_26, %c0_27] : memref<56x128xf32, #tpu.memory_space<vmem>>, vector<40x128xf32>
    %c9_28 = arith.constant 9 : index
    %c0_29 = arith.constant 0 : index
    %27 = vector.load %arg6[%c9_28, %c0_29] : memref<56x128xf32, #tpu.memory_space<vmem>>, vector<40x128xf32>
    %28 = tpu.concatenate %25, %26, %27 in 1 : vector<40x128xf32>, vector<40x128xf32>, vector<40x128xf32> -> vector<40x384xf32>
    %c1_30 = arith.constant 1 : index
    %c0_31 = arith.constant 0 : index
    %c0_32 = arith.constant 0 : index
    %29 = vector.load %arg1[%c1_30, %c0_31, %c0_32] : memref<4x384x128xf32, #tpu.memory_space<vmem>>, vector<1x384x128xf32>
    %30 = vector.shape_cast %29 : vector<1x384x128xf32> to vector<384x128xf32>
    %cst_33 = arith.constant dense<0.000000e+00> : vector<40x128xf32>
    %31 = tpu.matmul %28, %30, %cst_33 {dimension_numbers = #tpu.dot_dimension_numbers<[1], [0], [0], [1], [0, 0, 1, 1], [], []>} : vector<40x384xf32>, vector<384x128xf32>, vector<40x128xf32> -> vector<40x128xf32>
    %c1_34 = arith.constant 1 : index
    %c0_35 = arith.constant 0 : index
    %c0_36 = arith.constant 0 : index
    %32 = vector.load %arg2[%c1_34, %c0_35, %c0_36] : memref<4x1x128xf32, #tpu.memory_space<vmem>>, vector<1x1x128xf32>
    %33 = vector.shape_cast %32 : vector<1x1x128xf32> to vector<1x128xf32>
    %34 = vector.broadcast %33 : vector<1x128xf32> to vector<40x128xf32>
    %35 = arith.addf %31, %34 : vector<40x128xf32>
    %cst_37 = arith.constant 0.000000e+00 : f32
    %36 = vector.broadcast %cst_37 : f32 to vector<40x128xf32>
    %37 = arith.maximumf %35, %36 : vector<40x128xf32>
    %38 = vector.extract_strided_slice %37 {offsets = [0, 0], sizes = [16, 128], strides = [1, 1]} : vector<40x128xf32> to vector<16x128xf32>
    %c8_38 = arith.constant 8 : index
    %c0_39 = arith.constant 0 : index
    %39 = vector.load %arg6[%c8_38, %c0_39] : memref<56x128xf32, #tpu.memory_space<vmem>>, vector<16x128xf32>
    tpu.vector_store %arg6[%c8_38, %c0_39], %38 {strides = array<i32>} : memref<56x128xf32, #tpu.memory_space<vmem>>, vector<16x128xf32>,
    %40 = vector.extract_strided_slice %37 {offsets = [24, 0], sizes = [16, 128], strides = [1, 1]} : vector<40x128xf32> to vector<16x128xf32>
    %c32_40 = arith.constant 32 : index
    %c0_41 = arith.constant 0 : index
    %41 = vector.load %arg6[%c32_40, %c0_41] : memref<56x128xf32, #tpu.memory_space<vmem>>, vector<16x128xf32>
    tpu.vector_store %arg6[%c32_40, %c0_41], %40 {strides = array<i32>} : memref<56x128xf32, #tpu.memory_space<vmem>>, vector<16x128xf32>,
    %c7_42 = arith.constant 7 : index
    %c0_43 = arith.constant 0 : index
    %42 = vector.load %arg6[%c7_42, %c0_43] : memref<56x128xf32, #tpu.memory_space<vmem>>, vector<40x128xf32>
    %c8_44 = arith.constant 8 : index
    %c0_45 = arith.constant 0 : index
    %43 = vector.load %arg6[%c8_44, %c0_45] : memref<56x128xf32, #tpu.memory_space<vmem>>, vector<40x128xf32>
    %c9_46 = arith.constant 9 : index
    %c0_47 = arith.constant 0 : index
    %44 = vector.load %arg6[%c9_46, %c0_47] : memref<56x128xf32, #tpu.memory_space<vmem>>, vector<40x128xf32>
    %45 = tpu.concatenate %42, %43, %44 in 1 : vector<40x128xf32>, vector<40x128xf32>, vector<40x128xf32> -> vector<40x384xf32>
    %c2 = arith.constant 2 : index
    %c0_48 = arith.constant 0 : index
    %c0_49 = arith.constant 0 : index
    %46 = vector.load %arg1[%c2, %c0_48, %c0_49] : memref<4x384x128xf32, #tpu.memory_space<vmem>>, vector<1x384x128xf32>
    %47 = vector.shape_cast %46 : vector<1x384x128xf32> to vector<384x128xf32>
    %cst_50 = arith.constant dense<0.000000e+00> : vector<40x128xf32>
    %48 = tpu.matmul %45, %47, %cst_50 {dimension_numbers = #tpu.dot_dimension_numbers<[1], [0], [0], [1], [0, 0, 1, 1], [], []>} : vector<40x384xf32>, vector<384x128xf32>, vector<40x128xf32> -> vector<40x128xf32>
    %c2_51 = arith.constant 2 : index
    %c0_52 = arith.constant 0 : index
    %c0_53 = arith.constant 0 : index
    %49 = vector.load %arg2[%c2_51, %c0_52, %c0_53] : memref<4x1x128xf32, #tpu.memory_space<vmem>>, vector<1x1x128xf32>
    %50 = vector.shape_cast %49 : vector<1x1x128xf32> to vector<1x128xf32>
    %51 = vector.broadcast %50 : vector<1x128xf32> to vector<40x128xf32>
    %52 = arith.addf %48, %51 : vector<40x128xf32>
    %cst_54 = arith.constant 0.000000e+00 : f32
    %53 = vector.broadcast %cst_54 : f32 to vector<40x128xf32>
    %54 = arith.maximumf %52, %53 : vector<40x128xf32>
    %55 = vector.extract_strided_slice %54 {offsets = [0, 0], sizes = [16, 128], strides = [1, 1]} : vector<40x128xf32> to vector<16x128xf32>
    %c8_55 = arith.constant 8 : index
    %c0_56 = arith.constant 0 : index
    %56 = vector.load %arg6[%c8_55, %c0_56] : memref<56x128xf32, #tpu.memory_space<vmem>>, vector<16x128xf32>
    tpu.vector_store %arg6[%c8_55, %c0_56], %55 {strides = array<i32>} : memref<56x128xf32, #tpu.memory_space<vmem>>, vector<16x128xf32>,
    %57 = vector.extract_strided_slice %54 {offsets = [24, 0], sizes = [16, 128], strides = [1, 1]} : vector<40x128xf32> to vector<16x128xf32>
    %c32_57 = arith.constant 32 : index
    %c0_58 = arith.constant 0 : index
    %58 = vector.load %arg6[%c32_57, %c0_58] : memref<56x128xf32, #tpu.memory_space<vmem>>, vector<16x128xf32>
    tpu.vector_store %arg6[%c32_57, %c0_58], %57 {strides = array<i32>} : memref<56x128xf32, #tpu.memory_space<vmem>>, vector<16x128xf32>,
    %c7_59 = arith.constant 7 : index
    %c0_60 = arith.constant 0 : index
    %59 = vector.load %arg6[%c7_59, %c0_60] : memref<56x128xf32, #tpu.memory_space<vmem>>, vector<40x128xf32>
    %c8_61 = arith.constant 8 : index
    %c0_62 = arith.constant 0 : index
    %60 = vector.load %arg6[%c8_61, %c0_62] : memref<56x128xf32, #tpu.memory_space<vmem>>, vector<40x128xf32>
    %c9_63 = arith.constant 9 : index
    %c0_64 = arith.constant 0 : index
    %61 = vector.load %arg6[%c9_63, %c0_64] : memref<56x128xf32, #tpu.memory_space<vmem>>, vector<40x128xf32>
    %62 = tpu.concatenate %59, %60, %61 in 1 : vector<40x128xf32>, vector<40x128xf32>, vector<40x128xf32> -> vector<40x384xf32>
    %c3 = arith.constant 3 : index
    %c0_65 = arith.constant 0 : index
    %c0_66 = arith.constant 0 : index
    %63 = vector.load %arg1[%c3, %c0_65, %c0_66] : memref<4x384x128xf32, #tpu.memory_space<vmem>>, vector<1x384x128xf32>
    %64 = vector.shape_cast %63 : vector<1x384x128xf32> to vector<384x128xf32>
    %cst_67 = arith.constant dense<0.000000e+00> : vector<40x128xf32>
    %65 = tpu.matmul %62, %64, %cst_67 {dimension_numbers = #tpu.dot_dimension_numbers<[1], [0], [0], [1], [0, 0, 1, 1], [], []>} : vector<40x384xf32>, vector<384x128xf32>, vector<40x128xf32> -> vector<40x128xf32>
    %c3_68 = arith.constant 3 : index
    %c0_69 = arith.constant 0 : index
    %c0_70 = arith.constant 0 : index
    %66 = vector.load %arg2[%c3_68, %c0_69, %c0_70] : memref<4x1x128xf32, #tpu.memory_space<vmem>>, vector<1x1x128xf32>
    %67 = vector.shape_cast %66 : vector<1x1x128xf32> to vector<1x128xf32>
    %68 = vector.broadcast %67 : vector<1x128xf32> to vector<40x128xf32>
    %69 = arith.addf %65, %68 : vector<40x128xf32>
    %cst_71 = arith.constant 0.000000e+00 : f32
    %70 = vector.broadcast %cst_71 : f32 to vector<40x128xf32>
    %71 = arith.maximumf %69, %70 : vector<40x128xf32>
    %c0_72 = arith.constant 0 : index
    %c0_73 = arith.constant 0 : index
    %72 = vector.load %arg3[%c0_72, %c0_73] : memref<128x128xf32, #tpu.memory_space<vmem>>, vector<128x128xf32>
    %cst_74 = arith.constant dense<0.000000e+00> : vector<40x128xf32>
    %73 = tpu.matmul %71, %72, %cst_74 {dimension_numbers = #tpu.dot_dimension_numbers<[1], [0], [0], [1], [0, 0, 1, 1], [], []>} : vector<40x128xf32>, vector<128x128xf32>, vector<40x128xf32> -> vector<40x128xf32>
    %74 = vector.extract_strided_slice %71 {offsets = [0, 0], sizes = [16, 128], strides = [1, 1]} : vector<40x128xf32> to vector<16x128xf32>
    %c0_75 = arith.constant 0 : index
    %c0_76 = arith.constant 0 : index
    %c0_77 = arith.constant 0 : index
    %75 = vector.load %arg4[%c0_75, %c0_76, %c0_77] : memref<2x16x128xf32, #tpu.memory_space<vmem>>, vector<1x16x128xf32>
    %76 = vector.shape_cast %75 : vector<1x16x128xf32> to vector<16x128xf32>
    %77 = vector.shape_cast %74 : vector<16x128xf32> to vector<1x16x128xf32>
    tpu.vector_store %arg4[%c0_75, %c0_76, %c0_77], %77 {strides = array<i32>} : memref<2x16x128xf32, #tpu.memory_space<vmem>>, vector<1x16x128xf32>,
    %78 = vector.extract_strided_slice %73 {offsets = [0, 0], sizes = [16, 128], strides = [1, 1]} : vector<40x128xf32> to vector<16x128xf32>
    %c0_78 = arith.constant 0 : index
    %c0_79 = arith.constant 0 : index
    %c0_80 = arith.constant 0 : index
    %79 = vector.load %arg5[%c0_78, %c0_79, %c0_80] : memref<2x16x128xf32, #tpu.memory_space<vmem>>, vector<1x16x128xf32>
    %80 = vector.shape_cast %79 : vector<1x16x128xf32> to vector<16x128xf32>
    %81 = vector.shape_cast %78 : vector<16x128xf32> to vector<1x16x128xf32>
    tpu.vector_store %arg5[%c0_78, %c0_79, %c0_80], %81 {strides = array<i32>} : memref<2x16x128xf32, #tpu.memory_space<vmem>>, vector<1x16x128xf32>,
    %82 = vector.extract_strided_slice %71 {offsets = [24, 0], sizes = [16, 128], strides = [1, 1]} : vector<40x128xf32> to vector<16x128xf32>
    %c1_81 = arith.constant 1 : index
    %c0_82 = arith.constant 0 : index
    %c0_83 = arith.constant 0 : index
    %83 = vector.load %arg4[%c1_81, %c0_82, %c0_83] : memref<2x16x128xf32, #tpu.memory_space<vmem>>, vector<1x16x128xf32>
    %84 = vector.shape_cast %83 : vector<1x16x128xf32> to vector<16x128xf32>
    %85 = vector.shape_cast %82 : vector<16x128xf32> to vector<1x16x128xf32>
    tpu.vector_store %arg4[%c1_81, %c0_82, %c0_83], %85 {strides = array<i32>} : memref<2x16x128xf32, #tpu.memory_space<vmem>>, vector<1x16x128xf32>,
    %86 = vector.extract_strided_slice %73 {offsets = [24, 0], sizes = [16, 128], strides = [1, 1]} : vector<40x128xf32> to vector<16x128xf32>
    %c1_84 = arith.constant 1 : index
    %c0_85 = arith.constant 0 : index
    %c0_86 = arith.constant 0 : index
    %87 = vector.load %arg5[%c1_84, %c0_85, %c0_86] : memref<2x16x128xf32, #tpu.memory_space<vmem>>, vector<1x16x128xf32>
    %88 = vector.shape_cast %87 : vector<1x16x128xf32> to vector<16x128xf32>
    %89 = vector.shape_cast %86 : vector<16x128xf32> to vector<1x16x128xf32>
    tpu.vector_store %arg5[%c1_84, %c0_85, %c0_86], %89 {strides = array<i32>} : memref<2x16x128xf32, #tpu.memory_space<vmem>>, vector<1x16x128xf32>,
    return
  }
}

</mosaic_0001>

<bundles_post_ra>
// kernel: model_forward.1
= control target key start
LH: loop header
LB: loop body
LE: loop exit
PB: predicated region body
PF: predicated region fallthrough
CT: control target
= control target key end

     0   :  { %11 = vsyncpa [#allocation4], 0  ;;  %s2341_s0 = inlined_call_operand.vmem [shape: f32[2,16,64], index: 0, kind: input, shape index: {}]   ;;  %s2342_s1 = inlined_call_operand.hbm [shape: f32[4,384,128], index: 1, kind: input, shape index: {}]   ;;  %s2343_s2 = inlined_call_operand.vmem [shape: f32[4,1,128], index: 2, kind: input, shape index: {}]   ;;  %s2344_s3 = inlined_call_operand.vmem [shape: f32[128,128], index: 3, kind: input, shape index: {}]   ;;  %s2345_s4 = inlined_call_operand.vmem [shape: f32[2,16,128], index: 4, kind: output, shape index: {0}]   ;;  %s2346_s5 = inlined_call_operand.hbm [shape: f32[2,16,128], index: 5, kind: output, shape index: {1}]  }
   0x1   :  { %12 = vsyncpa [#allocation5], 0  ;;  %s2075_s18 = smov [#allocation3]   ;;  %s2027_s22 = scalar_lea.hbm %s2342_s1, 24576 }
   0x2   :  { %s20_s19 = sshll.u32 %s2075_s18, 4  ;;  %p2028_p0 = scmp.ne.s32.totalorder %s2342_s1, %s2027_s22  ;;  %s21_s19 = int_to_ptr.vmem [resolvable:$true] %s20_s19 }
   0x3   :  { %p2031_p1 = scmp.lt.u32.totalorder %s2027_s22, %s2342_s1 }
   0x5   :  { %p2033_p2 = pnand %p2031_p1, %p2028_p0 }
   0x7   :  { %2036 = shalt.err (!%p2033_p2)
}
   0x8   :  { %s2037_s27 = scalar_lea.vmem %s21_s19, 24576  ;;  %p2042_p4 = scmp.lt.s32.totalorder %s21_s19, %s21_s19 }
   0x9   :  { %p2038_p3 = scmp.ne.s32.totalorder %s21_s19, %s2037_s27  ;;  %p2043_p5 = scmp.lt.s32.totalorder %s2037_s27, %s2037_s27 }
   0xb   :  { %p2044_p6 = por %p2043_p5, %p2042_p4 }
   0xd   :  { %p2045_p7 = pnand %p2044_p6, %p2038_p3 }
   0xf   :  { %2048 = shalt.err (!%p2045_p7)
}
  0x10   :  { %s2076_s28 = smov 128   ;;  %s2077_s29 = smov 8  }
  0x11   :  { %26 = dma.hbm_to_vmem [thread:$0]  %s2342_s1, 24576, %s21_s19, [#allocation4], %s2076_s28, %s2076_s28, %s2077_s29  }
  0x12   :  { %2071 = dma.done.wait [#allocation4], 24576  }
  0x13   :  { %2072 = vsyncadd [#allocation4], 4294942720  ;;  %v2078_v0 = vmov 0.0|0.0   ;;  %v2079_v1 = vmov 0.0   ;;  %vm2080_vm0 = vmmov 0   ;;  %v82_v2 = vld [vmem:[#allocation3 + $0x80] sm:$0xff] }
  0x14   :  { %1787 = vmatprep.subr.bf16.mxu1 %v2078_v0  ;;  %35 = vst [vmem:[#allocation2 + $0x8] sm:$0xff] %v2079_v1  ;;  %34 = vst [vmem:[#allocation2] sm:$0xff] %v2079_v1  ;;  %1552 = vmatprep.mubr.msk.f32.mxu1 %vm2080_vm0, %v2079_v1  ;;  %v83_v3 = vld [vmem:[#allocation3 + $0x88] sm:$0xff]  ;;  %v66_v4 = vld [vmem:[#allocation3] sm:$0xff]  ;;  %vm43_vm1 = vcmask 523264   ;;  %s2081_s10 = smov [#allocation6]  }
  0x15   :  { %36 = vst [vmem:[#allocation2 + $0x10] sm:$0xff] %v2079_v1  ;;  %37 = vst [vmem:[#allocation2 + $0x18] sm:$0xff] %v2079_v1  ;;  %v1755_v5 = vpack.c.bf16 %v83_v3, %v82_v2  ;;  %v67_v6 = vld [vmem:[#allocation3 + $0x8] sm:$0xff]  ;;  %v84_v7 = vld [vmem:[#allocation3 + $0x90] sm:$0xff]  ;;  %s1202_s11 = sshll.u32 %s2081_s10, 4  ;;  %s1203_s11 = int_to_ptr.vmem [resolvable:$true] %s1202_s11 }
  0x16   :  { %38 = vst [vmem:[#allocation2 + $0x20] sm:$0xff] %v2079_v1  ;;  %39 = vst [vmem:[#allocation2 + $0x28] sm:$0xff] %v2079_v1  ;;  %v85_v8 = vld [vmem:[#allocation3 + $0x98] sm:$0xff]  ;;  %v1757_v9 = vpack.c.bf16 %v67_v6, %v66_v4  ;;  %v68_v11 = vld [vmem:[#allocation3 + $0x10] sm:$0xff]  ;;  %s2049_s12 = scalar_lea.vmem %s1203_s11, 512  ;;  %p2054_p9 = scmp.lt.s32.totalorder %s1203_s11, %s1203_s11 }
  0x17   :  { %40 = vst [vmem:[#allocation2 + $0x30] sm:$0xff] %v2079_v1  ;;  %v1759_v10 = vpack.c.bf16 %v85_v8, %v84_v7  ;;  %v69_v12 = vld [vmem:[#allocation3 + $0x18] sm:$0xff]  ;;  %v98_v13 = vld [vmem:[#allocation3 + $0x100] sm:$0xff]  ;;  %1756 = vmatprep.subr.bf16.mxu0 %v1755_v5  ;;  %v99_v14 = vld [vmem:[#allocation3 + $0x108] sm:$0xff]  ;;  %p2050_p8 = scmp.ne.s32.totalorder %s1203_s11, %s2049_s12  ;;  %p2055_p10 = scmp.lt.s32.totalorder %s2049_s12, %s2049_s12 }
  0x18   :  { %v86_v15 = vld [vmem:[#allocation3 + $0xa0] sm:$0xff]  ;;  %v87_v16 = vld [vmem:[#allocation3 + $0xa8] sm:$0xff]  ;;  %1758 = vmatpush3.bf16.msra.mxu0 %v1757_v9  ;;  %v1761_v17 = vpack.c.bf16 %v69_v12, %v68_v11  ;;  %v1788_v18 = vpack.c.bf16 %v99_v14, %v98_v13  ;;  %v100_v19 = vld [vmem:[#allocation3 + $0x110] sm:$0xff] }
  0x19   :  { %1760 = vmatprep.subr.bf16.mxu0 %v1759_v10  ;;  %v1763_v20 = vpack.c.bf16 %v87_v16, %v86_v15  ;;  %v70_v21 = vld [vmem:[#allocation3 + $0x20] sm:$0xff]  ;;  %v71_v22 = vld [vmem:[#allocation3 + $0x28] sm:$0xff]  ;;  %v101_v23 = vld [vmem:[#allocation3 + $0x118] sm:$0xff]  ;;  %p2056_p11 = por %p2055_p10, %p2054_p9 }
  0x1a   :  { %1789 = vmatpush3.bf16.msra.mxu1 %v1788_v18  ;;  %v1791_v24 = vpack.c.bf16 %v101_v23, %v100_v19  ;;  %v88_v25 = vld [vmem:[#allocation3 + $0xb0] sm:$0xff]  ;;  %v89_v26 = vld [vmem:[#allocation3 + $0xb8] sm:$0xff]  ;;  %v102_v27 = vld [vmem:[#allocation3 + $0x120] sm:$0xff]  ;;  %v1765_v29 = vpack.c.bf16 %v71_v22, %v70_v21 }
  0x1b   :  { %1790 = vmatprep.subr.bf16.mxu1 %v2078_v0  ;;  %v103_v28 = vld [vmem:[#allocation3 + $0x128] sm:$0xff]  ;;  %v1767_v30 = vpack.c.bf16 %v89_v26, %v88_v25  ;;  %v72_v31 = vld [vmem:[#allocation3 + $0x30] sm:$0xff]  ;;  %v73_v32 = vld [vmem:[#allocation3 + $0x38] sm:$0xff]  ;;  %p2057_p12 = pnand %p2056_p11, %p2050_p8 }
  0x1c   :  { %1762 = vmatpush3.bf16.msra.mxu0 %v1761_v17  ;;  %v1794_v33 = vpack.c.bf16 %v103_v28, %v102_v27  ;;  %v90_v34 = vld [vmem:[#allocation3 + $0xc0] sm:$0xff]  ;;  %v91_v35 = vld [vmem:[#allocation3 + $0xc8] sm:$0xff]  ;;  %v104_v36 = vld [vmem:[#allocation3 + $0x130] sm:$0xff]  ;;  %v1769_v38 = vpack.c.bf16 %v73_v32, %v72_v31 }
  0x1d   :  { %1764 = vmatprep.subr.bf16.mxu0 %v1763_v20  ;;  %v105_v37 = vld [vmem:[#allocation3 + $0x138] sm:$0xff]  ;;  %v1771_v39 = vpack.c.bf16 %v91_v35, %v90_v34  ;;  %v74_v40 = vld [vmem:[#allocation3 + $0x40] sm:$0xff]  ;;  %v75_v41 = vld [vmem:[#allocation3 + $0x48] sm:$0xff] }
  0x1e   :  { %1792 = vmatpush3.bf16.msra.mxu1 %v1791_v24  ;;  %v1797_v42 = vpack.c.bf16 %v105_v37, %v104_v36  ;;  %v92_v43 = vld [vmem:[#allocation3 + $0xd0] sm:$0xff]  ;;  %v93_v44 = vld [vmem:[#allocation3 + $0xd8] sm:$0xff]  ;;  %v106_v45 = vld [vmem:[#allocation3 + $0x140] sm:$0xff]  ;;  %v1773_v48 = vpack.c.bf16 %v75_v41, %v74_v40 }
  0x1f   :  { %1793 = vmatprep.subr.bf16.mxu1 %v2078_v0  ;;  %v107_v46 = vld [vmem:[#allocation3 + $0x148] sm:$0xff]  ;;  %v42_v49 = vld [vmem:[%s2341_s0 + $0x8] sm:$0xff]  ;;  %v1216_v50 = vld [vmem:[%s2341_s0 + $0x10] sm:$0xff]  ;;  %v1775_v51 = vpack.c.bf16 %v93_v44, %v92_v43 }
  0x20   :  { %1766 = vmatpush3.bf16.msra.mxu0 %v1765_v29  ;;  %v41_v47 = vld [vmem:[%s2341_s0] sm:$0xff]  ;;  %v76_v52 = vld [vmem:[#allocation3 + $0x50] sm:$0xff]  ;;  %v77_v53 = vld [vmem:[#allocation3 + $0x58] sm:$0xff]  ;;  %45 = vst.msk [vmem:[#allocation2 + $0x10] sm:$0xff] %vm43_vm1, %v42_v49  ;;  %v1800_v55 = vpack.c.bf16 %v107_v46, %v106_v45 }
  0x21   :  { %1768 = vmatprep.subr.bf16.mxu0 %v1767_v30  ;;  %44 = vst.msk [vmem:[#allocation2 + $0x8] sm:$0xff] %vm43_vm1, %v41_v47  ;;  %49 = vst.msk [vmem:[#allocation2 + $0x20] sm:$0xff] %vm43_vm1, %v1216_v50  ;;  %v1217_v54 = vld [vmem:[%s2341_s0 + $0x18] sm:$0xff]  ;;  %v95_v57 = vld [vmem:[#allocation3 + $0xe8] sm:$0xff]  ;;  %v1777_v60 = vpack.c.bf16 %v77_v53, %v76_v52 }
  0x22   :  { %1795 = vmatpush3.bf16.msra.mxu1 %v1794_v33  ;;  %v94_v56 = vld [vmem:[#allocation3 + $0xe0] sm:$0xff]  ;;  %50 = vst.msk [vmem:[#allocation2 + $0x28] sm:$0xff] %vm43_vm1, %v1217_v54  ;;  %v108_v58 = vld [vmem:[#allocation3 + $0x150] sm:$0xff]  ;;  %v109_v59 = vld [vmem:[#allocation3 + $0x158] sm:$0xff] }
  0x23   :  { %1796 = vmatprep.subr.bf16.mxu1 %v2078_v0  ;;  %v1779_v61 = vpack.c.bf16 %v95_v57, %v94_v56  ;;  %v78_v62 = vld [vmem:[#allocation3 + $0x60] sm:$0xff]  ;;  %v79_v63 = vld [vmem:[#allocation3 + $0x68] sm:$0xff]  ;;  %v1803_v2 = vpack.c.bf16 %v109_v59, %v108_v58  ;;  %v96_v3 = vld [vmem:[#allocation3 + $0xf0] sm:$0xff] }
  0x24   :  { %1770 = vmatpush3.bf16.msra.mxu0 %v1769_v38  ;;  %v97_v4 = vld [vmem:[#allocation3 + $0xf8] sm:$0xff]  ;;  %v110_v5 = vld [vmem:[#allocation3 + $0x160] sm:$0xff]  ;;  %v111_v6 = vld [vmem:[#allocation3 + $0x168] sm:$0xff]  ;;  %v1781_v8 = vpack.c.bf16 %v79_v63, %v78_v62 }
  0x25   :  { %1772 = vmatprep.subr.bf16.mxu0 %v1771_v39  ;;  %v1783_v9 = vpack.c.bf16 %v97_v4, %v96_v3  ;;  %v80_v10 = vld [vmem:[#allocation3 + $0x70] sm:$0xff]  ;;  %v81_v11 = vld [vmem:[#allocation3 + $0x78] sm:$0xff]  ;;  %v1806_v12 = vpack.c.bf16 %v111_v6, %v110_v5  ;;  %v339_v13 = vld [vmem:[#allocation3 + $0x200] sm:$0xff] }
  0x26   :  { %1798 = vmatpush3.bf16.msra.mxu1 %v1797_v42  ;;  %v340_v14 = vld [vmem:[#allocation3 + $0x208] sm:$0xff]  ;;  %v112_v15 = vld [vmem:[#allocation3 + $0x170] sm:$0xff]  ;;  %v113_v16 = vld [vmem:[#allocation3 + $0x178] sm:$0xff]  ;;  %v1785_v17 = vpack.c.bf16 %v81_v11, %v80_v10 }
  0x27   :  { %1799 = vmatprep.subr.bf16.mxu1 %v2078_v0  ;;  %v1811_v18 = vpack.c.bf16 %v340_v14, %v339_v13  ;;  %v323_v19 = vld [vmem:[#allocation3 + $0x180] sm:$0xff]  ;;  %v324_v20 = vld [vmem:[#allocation3 + $0x188] sm:$0xff]  ;;  %v1809_v21 = vpack.c.bf16 %v113_v16, %v112_v15  ;;  %v341_v22 = vld [vmem:[#allocation3 + $0x210] sm:$0xff] }
  0x28   :  { %1774 = vmatpush3.bf16.msra.mxu0 %v1773_v48  ;;  %v56_v7 = vld [vmem:[#allocation2 + $0x8] sm:$0xff]  ;;  %v342_v23 = vld [vmem:[#allocation3 + $0x218] sm:$0xff]  ;;  %v355_v24 = vld [vmem:[#allocation3 + $0x280] sm:$0xff]  ;;  %v1813_v27 = vpack.c.bf16 %v324_v20, %v323_v19 }
  0x29   :  { %1776 = vmatprep.subr.bf16.mxu0 %v1775_v51  ;;  %185 = vmatprep.mubr.f32.mxu0 %v56_v7  ;;  %v356_v25 = vld [vmem:[#allocation3 + $0x288] sm:$0xff]  ;;  %v57_v28 = vld [vmem:[#allocation2 + $0x10] sm:$0xff]  ;;  %v1815_v29 = vpack.c.bf16 %v342_v23, %v341_v22  ;;  %v325_v30 = vld [vmem:[#allocation3 + $0x190] sm:$0xff] }
  0x2a   :  { %1801 = vmatpush3.bf16.msra.mxu1 %v1800_v55  ;;  %v51_v26 = vld [vmem:[#allocation2 + $0x7] sm:$0xff]  ;;  %v326_v31 = vld [vmem:[#allocation3 + $0x198] sm:$0xff]  ;;  %v1844_v33 = vpack.c.bf16 %v356_v25, %v355_v24  ;;  %v343_v34 = vld [vmem:[#allocation3 + $0x220] sm:$0xff] }
  0x2b   :  { %1802 = vmatprep.subr.bf16.mxu1 %v2078_v0  ;;  %v61_v32 = vld [vmem:[#allocation2 + $0x9] sm:$0xff]  ;;  %v344_v35 = vld [vmem:[#allocation3 + $0x228] sm:$0xff]  ;;  %v1817_v39 = vpack.c.bf16 %v326_v31, %v325_v30  ;;  %v327_v41 = vld [vmem:[#allocation3 + $0x1a0] sm:$0xff] }
  0x2c   :  { %1778 = vmatpush3.bf16.msra.mxu0 %v1777_v60  ;;  %v357_v36 = vld [vmem:[#allocation3 + $0x290] sm:$0xff]  ;;  %v358_v37 = vld [vmem:[#allocation3 + $0x298] sm:$0xff]  ;;  %v1819_v40 = vpack.c.bf16 %v344_v35, %v343_v34  ;;  %v328_v42 = vld [vmem:[#allocation3 + $0x1a8] sm:$0xff] }
  0x2d   :  { %1780 = vmatprep.subr.bf16.mxu0 %v1779_v61  ;;  %v52_v38 = vld [vmem:[#allocation2 + $0xf] sm:$0xff]  ;;  %v1847_v44 = vpack.c.bf16 %v358_v37, %v357_v36  ;;  %v359_v47 = vld [vmem:[#allocation3 + $0x2a0] sm:$0xff]  ;;  %v360_v48 = vld [vmem:[#allocation3 + $0x2a8] sm:$0xff]  ;;  %v1821_v50 = vpack.c.bf16 %v328_v42, %v327_v41 }
  0x2e   :  { %1804 = vmatpush3.bf16.msra.mxu1 %v1803_v2  ;;  %v62_v43 = vld [vmem:[#allocation2 + $0x11] sm:$0xff]  ;;  %v345_v45 = vld [vmem:[#allocation3 + $0x230] sm:$0xff]  ;;  %v59_v51 = vld [vmem:[#allocation2 + $0x20] sm:$0xff]  ;;  %v1850_v54 = vpack.c.bf16 %v360_v48, %v359_v47 }
  0x2f   :  { %1805 = vmatprep.subr.bf16.mxu1 %v2078_v0  ;;  %v346_v46 = vld [vmem:[#allocation3 + $0x238] sm:$0xff]  ;;  %v63_v53 = vld [vmem:[#allocation2 + $0x19] sm:$0xff]  ;;  %v60_v56 = vld [vmem:[#allocation2 + $0x28] sm:$0xff] }
  0x30   :  { %1782 = vmatpush3.bf16.msra.mxu0 %v1781_v8  ;;  %v53_v49 = vld [vmem:[#allocation2 + $0x17] sm:$0xff]  ;;  %v1823_v52 = vpack.c.bf16 %v346_v46, %v345_v45  ;;  %v54_v55 = vld [vmem:[#allocation2 + $0x1f] sm:$0xff]  ;;  %v55_v58 = vld [vmem:[#allocation2 + $0x27] sm:$0xff] }
  0x31   :  { %1784 = vmatprep.subr.bf16.mxu0 %v1783_v9  ;;  %v64_v57 = vld [vmem:[#allocation2 + $0x21] sm:$0xff]  ;;  %v65_v59 = vld [vmem:[#allocation2 + $0x29] sm:$0xff]  ;;  %v347_v63 = vld [vmem:[#allocation3 + $0x240] sm:$0xff] }
  0x32   :  { %1807 = vmatpush3.bf16.msra.mxu1 %v1806_v12  ;;  %v329_v60 = vld [vmem:[#allocation3 + $0x1b0] sm:$0xff]  ;;  %v330_v61 = vld [vmem:[#allocation3 + $0x1b8] sm:$0xff]  ;;  %v348_v2 = vld [vmem:[#allocation3 + $0x248] sm:$0xff] }
  0x33   :  { %1808 = vmatprep.subr.bf16.mxu1 %v2078_v0  ;;  %v1825_v62 = vpack.c.bf16 %v330_v61, %v329_v60  ;;  %v1827_v3 = vpack.c.bf16 %v348_v2, %v347_v63  ;;  %v361_v4 = vld [vmem:[#allocation3 + $0x2b0] sm:$0xff]  ;;  %v362_v5 = vld [vmem:[#allocation3 + $0x2b8] sm:$0xff]  ;;  %v331_v6 = vld [vmem:[#allocation3 + $0x1c0] sm:$0xff] }
  0x34   :  { %1786 = vmatpush3.bf16.msra.mxu0 %v1785_v17  ;;  %v1853_v7 = vpack.c.bf16 %v362_v5, %v361_v4  ;;  %v332_v8 = vld [vmem:[#allocation3 + $0x1c8] sm:$0xff]  ;;  %v349_v10 = vld [vmem:[#allocation3 + $0x250] sm:$0xff]  ;;  %v350_v11 = vld [vmem:[#allocation3 + $0x258] sm:$0xff] }
  0x35   :  { %1812 = vmatprep.subr.bf16.mxu0 %v1811_v18  ;;  %v1829_v9 = vpack.c.bf16 %v332_v8, %v331_v6  ;;  %v1831_v12 = vpack.c.bf16 %v350_v11, %v349_v10  ;;  %v363_v13 = vld [vmem:[#allocation3 + $0x2c0] sm:$0xff]  ;;  %v364_v14 = vld [vmem:[#allocation3 + $0x2c8] sm:$0xff]  ;;  %v333_v15 = vld [vmem:[#allocation3 + $0x1d0] sm:$0xff] }
  0x36   :  { %1810 = vmatpush3.bf16.msra.mxu1 %v1809_v21  ;;  %v1856_v16 = vpack.c.bf16 %v364_v14, %v363_v13  ;;  %v334_v17 = vld [vmem:[#allocation3 + $0x1d8] sm:$0xff]  ;;  %v351_v19 = vld [vmem:[#allocation3 + $0x260] sm:$0xff]  ;;  %v352_v20 = vld [vmem:[#allocation3 + $0x268] sm:$0xff] }
  0x37   :  { %186 = vmatmul.mubr.f32.vlgmr.msra.gmra.mrb[0].mxu0 %v51_v26  ;;  %1843 = vmatprep.subr.bf16.mxu1 %v2078_v0  ;;  %v1833_v18 = vpack.c.bf16 %v334_v17, %v333_v15  ;;  %v1835_v21 = vpack.c.bf16 %v352_v20, %v351_v19  ;;  %v365_v22 = vld [vmem:[#allocation3 + $0x2d0] sm:$0xff]  ;;  %v366_v23 = vld [vmem:[#allocation3 + $0x2d8] sm:$0xff]  ;;  %v335_v24 = vld [vmem:[#allocation3 + $0x1e0] sm:$0xff] }
  0x38   :  { %190 = vmatprep.mubr.f32.mxu0 %v57_v28  ;;  %1814 = vmatpush3.bf16.msra.mxu0 %v1813_v27  ;;  %v1859_v25 = vpack.c.bf16 %v366_v23, %v365_v22  ;;  %v336_v26 = vld [vmem:[#allocation3 + $0x1e8] sm:$0xff]  ;;  %v353_v28 = vld [vmem:[#allocation3 + $0x270] sm:$0xff]  ;;  %v367_v31 = vld [vmem:[#allocation3 + $0x2e0] sm:$0xff] }
  0x39   :  { %1553 = vmatmul.mubr.f32.vlgmr.msra.gmra.mrb[0].mxu1 %v61_v32  ;;  %1816 = vmatprep.subr.bf16.mxu0 %v1815_v29  ;;  %v1837_v27 = vpack.c.bf16 %v336_v26, %v335_v24  ;;  %v354_v29 = vld [vmem:[#allocation3 + $0x278] sm:$0xff]  ;;  %v368_v32 = vld [vmem:[#allocation3 + $0x2e8] sm:$0xff]  ;;  %v369_v37 = vld [vmem:[#allocation3 + $0x2f0] sm:$0xff] }
  0x3a   :  { %1555 = vmatprep.mubr.msk.f32.mxu1 %vm2080_vm0, %v2079_v1  ;;  %1845 = vmatpush3.bf16.msra.mxu1 %v1844_v33  ;;  %v1839_v30 = vpack.c.bf16 %v354_v29, %v353_v28  ;;  %v337_v33 = vld [vmem:[#allocation3 + $0x1f0] sm:$0xff]  ;;  %v1862_v34 = vpack.c.bf16 %v368_v32, %v367_v31  ;;  %v338_v35 = vld [vmem:[#allocation3 + $0x1f8] sm:$0xff]  ;;  %v598_v41 = vld [vmem:[#allocation3 + $0x388] sm:$0xff] }
  0x3b   :  { %191 = vmatmul.mubr.f32.gmra.mrb[2].mxu0 %v52_v38  ;;  %1846 = vmatprep.subr.bf16.mxu1 %v2078_v0  ;;  %v1841_v36 = vpack.c.bf16 %v338_v35, %v337_v33  ;;  %v370_v38 = vld [vmem:[#allocation3 + $0x2f8] sm:$0xff]  ;;  %v1218_v45 = vld [vmem:[%s2343_s2] ss:$0 sm:$0xff]  ;;  %v599_v6 = vld [vmem:[#allocation3 + $0x390] sm:$0xff] }
  0x3c   :  { %195 = vmatprep.mubr.f32.mxu0 %v2079_v1  ;;  %1818 = vmatpush3.bf16.msra.mxu0 %v1817_v39  ;;  %v1865_v39 = vpack.c.bf16 %v370_v38, %v369_v37  ;;  %v582_v4 = vld [vmem:[#allocation3 + $0x308] sm:$0xff]  ;;  %v613_v15 = vld [vmem:[#allocation3 + $0x400] sm:$0xff]  ;;  %v583_v19 = vld [vmem:[#allocation3 + $0x310] sm:$0xff] }
  0x3d   :  { %1556 = vmatmul.mubr.f32.gmra.mrb[2].mxu1 %v62_v43  ;;  %1820 = vmatprep.subr.bf16.mxu0 %v1819_v40  ;;  %v597_v40 = vld [vmem:[#allocation3 + $0x380] sm:$0xff]  ;;  %v584_v20 = vld [vmem:[#allocation3 + $0x318] sm:$0xff]  ;;  %v615_v31 = vld [vmem:[#allocation3 + $0x410] sm:$0xff] }
  0x3e   :  { %1558 = vmatprep.mubr.msk.f32.mxu1 %vm2080_vm0, %v2079_v1  ;;  %1848 = vmatpush3.bf16.msra.mxu1 %v1847_v44  ;;  %v1867_v42 = vpack.c.bf16 %v598_v41, %v597_v40  ;;  %v601_v24 = vld [vmem:[#allocation3 + $0x3a0] sm:$0xff]  ;;  %v616_v32 = vld [vmem:[#allocation3 + $0x418] sm:$0xff]  ;;  %v586_v37 = vld [vmem:[#allocation3 + $0x328] sm:$0xff] }
  0x3f   :  { %196 = vmatmul.mubr.f32.gmra.mrb[4].mxu0 %v53_v49  ;;  %1849 = vmatprep.subr.bf16.mxu1 %v2078_v0  ;;  %v585_v33 = vld [vmem:[#allocation3 + $0x320] sm:$0xff]  ;;  %v604_v40 = vld [vmem:[#allocation3 + $0x3b8] sm:$0xff] }
  0x40   :  { %199 = vmatprep.mubr.f32.mxu0 %v59_v51  ;;  %1822 = vmatpush3.bf16.msra.mxu0 %v1821_v50 }
  0x41   :  { %1559 = vmatmul.mubr.f32.gmra.mrb[4].mxu1 %v63_v53  ;;  %1824 = vmatprep.subr.bf16.mxu0 %v1823_v52 }
  0x42   :  { %1561 = vmatprep.mubr.msk.f32.mxu1 %vm2080_vm0, %v2079_v1  ;;  %1851 = vmatpush3.bf16.msra.mxu1 %v1850_v54 }
  0x43   :  { %200 = vmatmul.mubr.f32.gmra.mrb[6].mxu0 %v54_v55  ;;  %1852 = vmatprep.subr.bf16.mxu1 %v2078_v0 }
  0x44   :  { %204 = vmatprep.mubr.f32.mxu0 %v60_v56  ;;  %1826 = vmatpush3.bf16.msra.mxu0 %v1825_v62 }
  0x45   :  { %1562 = vmatmul.mubr.f32.gmra.mrb[6].mxu1 %v64_v57  ;;  %1828 = vmatprep.subr.bf16.mxu0 %v1827_v3  ;;  %v581_v3 = vld [vmem:[#allocation3 + $0x300] sm:$0xff] }
  0x46   :  { %1564 = vmatprep.mubr.msk.f32.mxu1 %vm2080_vm0, %v2079_v1  ;;  %1854 = vmatpush3.bf16.msra.mxu1 %v1853_v7  ;;  %v600_v7 = vld [vmem:[#allocation3 + $0x398] sm:$0xff]  ;;  %v1869_v11 = vpack.c.bf16 %v582_v4, %v581_v3  ;;  %v590_v3 = vld [vmem:[#allocation3 + $0x348] sm:$0xff] }
  0x47   :  { %205 = vmatmul.mubr.f32.gmra.mrb[8].mxu0 %v55_v58  ;;  %1855 = vmatprep.subr.bf16.mxu1 %v2078_v0  ;;  %v1871_v14 = vpack.c.bf16 %v600_v7, %v599_v6  ;;  %v608_v6 = vld [vmem:[#allocation3 + $0x3d8] sm:$0xff] }
  0x48   :  { %1830 = vmatpush3.bf16.msra.mxu0 %v1829_v9 }
  0x49   :  { %1565 = vmatmul.mubr.f32.gmra.mrb[8].mxu1 %v65_v59  ;;  %1832 = vmatprep.subr.bf16.mxu0 %v1831_v12 }
  0x4a   :  { %1599 = vmatprep.mubr.msk.f32.mxu1 %vm2080_vm0, %v2079_v1  ;;  %1857 = vmatpush3.bf16.msra.mxu1 %v1856_v16  ;;  %v614_v16 = vld [vmem:[#allocation3 + $0x408] sm:$0xff] }
  0x4b   :  { %1858 = vmatprep.subr.bf16.mxu1 %v2078_v0  ;;  %v1900_v29 = vpack.c.bf16 %v614_v16, %v613_v15  ;;  %v610_v15 = vld [vmem:[#allocation3 + $0x3e8] sm:$0xff] }
  0x4c   :  { %1834 = vmatpush3.bf16.msra.mxu0 %v1833_v18 }
  0x4d   :  { %1836 = vmatprep.subr.bf16.mxu0 %v1835_v21 }
  0x4e   :  { %1860 = vmatpush3.bf16.msra.mxu1 %v1859_v25  ;;  %v602_v25 = vld [vmem:[#allocation3 + $0x3a8] sm:$0xff] }
  0x4f   :  { %1861 = vmatprep.subr.bf16.mxu1 %v2078_v0 }
  0x50   :  { %1838 = vmatpush3.bf16.msra.mxu0 %v1837_v27 }
  0x51   :  { %1840 = vmatprep.subr.bf16.mxu0 %v1839_v30  ;;  %v1873_v30 = vpack.c.bf16 %v584_v20, %v583_v19  ;;  %v593_v19 = vld [vmem:[#allocation3 + $0x360] sm:$0xff] }
  0x52   :  { %1863 = vmatpush3.bf16.msra.mxu1 %v1862_v34 }
  0x53   :  { %1864 = vmatprep.subr.bf16.mxu1 %v2078_v0 }
  0x54   :  { %1842 = vmatpush3.bf16.msra.mxu0 %v1841_v36  ;;  %v1875_v36 = vpack.c.bf16 %v602_v25, %v601_v24  ;;  %v612_v24 = vld [vmem:[#allocation3 + $0x3f8] sm:$0xff] }
  0x55   :  { %1868 = vmatprep.subr.bf16.mxu0 %v1867_v42  ;;  %v1903_v42 = vpack.c.bf16 %v616_v32, %v615_v31  ;;  %v627_v32 = vld [vmem:[#allocation3 + $0x470] sm:$0xff] }
  0x56   :  { %1866 = vmatpush3.bf16.msra.mxu1 %v1865_v39  ;;  %v603_v39 = vld [vmem:[#allocation3 + $0x3b0] sm:$0xff] }
  0x57   :  { %1899 = vmatprep.subr.bf16.mxu1 %v2078_v0 }
 0x10a   :  { %v1259_v43 = vpop.f32.mrb[0].mxu0 }
 0x10b   :  { %v1260_v44 = vpop.f32.mrb[1].mxu0 }
 0x10c   :  { %v1261_v46 = vadd.f32 %v1260_v44, %v1259_v43  ;;  %v276_v47 = vpop.f32.mrb[0].mxu1  ;;  %v1877_v43 = vpack.c.bf16 %v586_v37, %v585_v33  ;;  %v617_v44 = vld [vmem:[#allocation3 + $0x420] sm:$0xff]  ;;  %v628_v33 = vld [vmem:[#allocation3 + $0x478] sm:$0xff] }
 0x10d   :  { %v1554_v48 = vpop.f32.mrb[1].mxu1 }
 0x10e   :  { %v1262_v49 = vpop.f32.mrb[2].mxu0  ;;  %v188_v50 = vadd.f32 %v1261_v46, %v1218_v45  ;;  %v618_v48 = vld [vmem:[#allocation3 + $0x428] sm:$0xff] }
 0x10f   :  { %v1263_v51 = vpop.f32.mrb[3].mxu0 }
 0x110   :  { %v277_v52 = vadd.f32 %v276_v47, %v188_v50  ;;  %v1264_v53 = vadd.f32 %v1263_v51, %v1262_v49  ;;  %v281_v54 = vpop.f32.mrb[2].mxu1  ;;  %v1879_v47 = vpack.c.bf16 %v604_v40, %v603_v39  ;;  %v1906_v49 = vpack.c.bf16 %v618_v48, %v617_v44  ;;  %v1220_v40 = vld [vmem:[%s2343_s2 + $0x1] ss:$0 sm:$0xff] }
 0x111   :  { %v1557_v55 = vpop.f32.mrb[3].mxu1 }
 0x112   :  { %v299_v56 = vmax.f32 %v277_v52, 0.0  ;;  %v1265_v57 = vpop.f32.mrb[4].mxu0  ;;  %v193_v58 = vadd.f32 %v1264_v53, %v1218_v45  ;;  %v587_v55 = vld [vmem:[#allocation3 + $0x330] sm:$0xff] }
 0x113   :  { %v1266_v59 = vpop.f32.mrb[5].mxu0 }
 0x114   :  { %303 = vst [vmem:[#allocation2 + $0x8] sm:$0xff] %v299_v56  ;;  %v282_v60 = vadd.f32 %v281_v54, %v193_v58  ;;  %v286_v61 = vpop.f32.mrb[4].mxu1  ;;  %443 = vmatprep.mubr.f32.mxu0 %v299_v56  ;;  %v588_v56 = vld [vmem:[#allocation3 + $0x338] sm:$0xff]  ;;  %v605_v58 = vld [vmem:[#allocation3 + $0x3c0] sm:$0xff]  ;;  %v606_v59 = vld [vmem:[#allocation3 + $0x3c8] sm:$0xff] }
 0x115   :  { %v1560_v62 = vpop.f32.mrb[5].mxu1  ;;  %v1881_v57 = vpack.c.bf16 %v588_v56, %v587_v55  ;;  %v619_v61 = vld [vmem:[#allocation3 + $0x430] sm:$0xff] }
 0x116   :  { %v300_v63 = vmax.f32 %v282_v60, 0.0  ;;  %v1268_v2 = vpop.f32.mrb[6].mxu0  ;;  %v1883_v60 = vpack.c.bf16 %v606_v59, %v605_v58  ;;  %v620_v62 = vld [vmem:[#allocation3 + $0x438] sm:$0xff]  ;;  %v839_v59 = vld [vmem:[#allocation3 + $0x480] sm:$0xff] }
 0x117   :  { %v1269_v5 = vpop.f32.mrb[7].mxu0 }
 0x118   :  { %304 = vst [vmem:[#allocation2 + $0x10] sm:$0xff] %v300_v63  ;;  %v1270_v8 = vadd.f32 %v1269_v5, %v1268_v2  ;;  %v290_v9 = vpop.f32.mrb[6].mxu1  ;;  %v1909_v2 = vpack.c.bf16 %v620_v62, %v619_v61  ;;  %v607_v5 = vld [vmem:[#allocation3 + $0x3d0] sm:$0xff] }
 0x119   :  { %v1563_v10 = vpop.f32.mrb[7].mxu1  ;;  %v1887_v7 = vpack.c.bf16 %v608_v6, %v607_v5 }
 0x11a   :  { %v1271_v12 = vpop.f32.mrb[8].mxu0  ;;  %v202_v13 = vadd.f32 %v1270_v8, %v1218_v45  ;;  %v621_v8 = vld [vmem:[#allocation3 + $0x440] sm:$0xff]  ;;  %v591_v10 = vld [vmem:[#allocation3 + $0x350] sm:$0xff] }
 0x11b   :  { %v1272_v17 = vpop.f32.mrb[9].mxu0  ;;  %v307_v18 = vld [vmem:[#allocation2 + $0x7] sm:$0xff] }
 0x11c   :  { %v291_v21 = vadd.f32 %v290_v9, %v202_v13  ;;  %v1273_v22 = vadd.f32 %v1272_v17, %v1271_v12  ;;  %444 = vmatmul.mubr.f32.vlgmr.msra.gmra.mrb[10].mxu0 %v307_v18  ;;  %v295_v23 = vpop.f32.mrb[8].mxu1  ;;  %v622_v9 = vld [vmem:[#allocation3 + $0x448] sm:$0xff]  ;;  %v592_v12 = vld [vmem:[#allocation3 + $0x358] sm:$0xff]  ;;  %v623_v17 = vld [vmem:[#allocation3 + $0x450] sm:$0xff] }
 0x11d   :  { %v1566_v26 = vpop.f32.mrb[9].mxu1  ;;  %448 = vmatprep.mubr.f32.mxu0 %v300_v63  ;;  %1870 = vmatpush3.bf16.msra.mxu0 %v1869_v11  ;;  %v589_v63 = vld [vmem:[#allocation3 + $0x340] sm:$0xff]  ;;  %v1912_v11 = vpack.c.bf16 %v622_v9, %v621_v8  ;;  %v1889_v13 = vpack.c.bf16 %v592_v12, %v591_v10  ;;  %v624_v18 = vld [vmem:[#allocation3 + $0x458] sm:$0xff]  ;;  %v872_v10 = vld [vmem:[#allocation3 + $0x588] sm:$0xff] }
 0x11e   :  { %v301_v27 = vmax.f32 %v291_v21, 0.0  ;;  %v207_v28 = vadd.f32 %v1273_v22, %v1218_v45  ;;  %1872 = vmatprep.subr.bf16.mxu0 %v1871_v14  ;;  %v1885_v4 = vpack.c.bf16 %v590_v3, %v589_v63  ;;  %v609_v14 = vld [vmem:[#allocation3 + $0x3e0] sm:$0xff]  ;;  %v1915_v20 = vpack.c.bf16 %v624_v18, %v623_v17  ;;  %v594_v21 = vld [vmem:[#allocation3 + $0x368] sm:$0xff]  ;;  %v857_v63 = vld [vmem:[#allocation3 + $0x510] sm:$0xff] }
 0x11f   :  { %v317_v34 = vld [vmem:[#allocation2 + $0x9] sm:$0xff]  ;;  %v318_v45 = vld [vmem:[#allocation2 + $0x11] sm:$0xff]  ;;  %v1891_v16 = vpack.c.bf16 %v610_v15, %v609_v14  ;;  %v1893_v22 = vpack.c.bf16 %v594_v21, %v593_v19  ;;  %v860_v19 = vld [vmem:[#allocation3 + $0x528] sm:$0xff] }
 0x120   :  { %v308_v35 = vld [vmem:[#allocation2 + $0xf] sm:$0xff]  ;;  %305 = vst [vmem:[#allocation2 + $0x20] sm:$0xff] %v301_v27  ;;  %v296_v38 = vadd.f32 %v295_v23, %v207_v28  ;;  %1600 = vmatmul.mubr.f32.vlgmr.msra.gmra.mrb[10].mxu1 %v317_v34  ;;  %v309_v46 = vld [vmem:[#allocation2 + $0x17] sm:$0xff]  ;;  %v1921_v34 = vpack.c.bf16 %v628_v33, %v627_v32  ;;  %v844_v32 = vld [vmem:[#allocation3 + $0x4a8] sm:$0xff] }
 0x121   :  { %449 = vmatmul.mubr.f32.gmra.mrb[12].mxu0 %v308_v35  ;;  %1602 = vmatprep.mubr.msk.f32.mxu1 %vm2080_vm0, %v2079_v1  ;;  %v611_v23 = vld [vmem:[#allocation3 + $0x3f0] sm:$0xff]  ;;  %v625_v26 = vld [vmem:[#allocation3 + $0x460] sm:$0xff]  ;;  %v842_v15 = vld [vmem:[#allocation3 + $0x498] sm:$0xff] }
 0x122   :  { %453 = vmatprep.mubr.f32.mxu0 %v2079_v1  ;;  %v302_v41 = vmax.f32 %v296_v38, 0.0  ;;  %1901 = vmatpush3.bf16.msra.mxu1 %v1900_v29  ;;  %v1895_v25 = vpack.c.bf16 %v612_v24, %v611_v23  ;;  %v595_v28 = vld [vmem:[#allocation3 + $0x370] sm:$0xff]  ;;  %v855_v35 = vld [vmem:[#allocation3 + $0x500] sm:$0xff] }
 0x123   :  { %1874 = vmatpush3.bf16.msra.mxu0 %v1873_v30  ;;  %1902 = vmatprep.subr.bf16.mxu1 %v2078_v0  ;;  %v596_v30 = vld [vmem:[#allocation3 + $0x378] sm:$0xff]  ;;  %v871_v9 = vld [vmem:[#allocation3 + $0x580] sm:$0xff]  ;;  %v841_v14 = vld [vmem:[#allocation3 + $0x490] sm:$0xff] }
 0x124   :  { %1876 = vmatprep.subr.bf16.mxu0 %v1875_v36  ;;  %306 = vst [vmem:[#allocation2 + $0x28] sm:$0xff] %v302_v41  ;;  %1603 = vmatmul.mubr.f32.gmra.mrb[12].mxu1 %v318_v45  ;;  %v1897_v31 = vpack.c.bf16 %v596_v30, %v595_v28  ;;  %v856_v36 = vld [vmem:[#allocation3 + $0x508] sm:$0xff]  ;;  %v859_v18 = vld [vmem:[#allocation3 + $0x520] sm:$0xff]  ;;  %v1956_v23 = vpack.c.bf16 %v872_v10, %v871_v9 }
 0x125   :  { %454 = vmatmul.mubr.f32.gmra.mrb[14].mxu0 %v309_v46  ;;  %1605 = vmatprep.mubr.msk.f32.mxu1 %vm2080_vm0, %v2079_v1  ;;  %v1923_v37 = vpack.c.bf16 %v856_v36, %v855_v35  ;;  %v1929_v24 = vpack.c.bf16 %v842_v15, %v841_v14  ;;  %v862_v35 = vld [vmem:[#allocation3 + $0x538] sm:$0xff]  ;;  %v867_v9 = vld [vmem:[#allocation3 + $0x560] sm:$0xff]  ;;  %v868_v10 = vld [vmem:[#allocation3 + $0x568] sm:$0xff] }
 0x126   :  { %457 = vmatprep.mubr.f32.mxu0 %v301_v27  ;;  %1904 = vmatpush3.bf16.msra.mxu1 %v1903_v42  ;;  %v626_v27 = vld [vmem:[#allocation3 + $0x468] sm:$0xff]  ;;  %v851_v14 = vld [vmem:[#allocation3 + $0x4e0] sm:$0xff] }
 0x127   :  { %1878 = vmatpush3.bf16.msra.mxu0 %v1877_v43  ;;  %v319_v50 = vld [vmem:[#allocation2 + $0x19] sm:$0xff]  ;;  %1905 = vmatprep.subr.bf16.mxu1 %v2078_v0  ;;  %v1918_v29 = vpack.c.bf16 %v626_v27, %v625_v26  ;;  %v874_v26 = vld [vmem:[#allocation3 + $0x598] sm:$0xff] }
 0x128   :  { %v310_v51 = vld [vmem:[#allocation2 + $0x1f] sm:$0xff]  ;;  %1880 = vmatprep.subr.bf16.mxu0 %v1879_v47  ;;  %1606 = vmatmul.mubr.f32.gmra.mrb[14].mxu1 %v319_v50 }
 0x129   :  { %458 = vmatmul.mubr.f32.gmra.mrb[16].mxu0 %v310_v51  ;;  %1608 = vmatprep.mubr.msk.f32.mxu1 %vm2080_vm0, %v2079_v1  ;;  %v843_v27 = vld [vmem:[#allocation3 + $0x4a0] sm:$0xff] }
 0x12a   :  { %462 = vmatprep.mubr.f32.mxu0 %v302_v41  ;;  %1907 = vmatpush3.bf16.msra.mxu1 %v1906_v49 }
 0x12b   :  { %v320_v52 = vld [vmem:[#allocation2 + $0x21] sm:$0xff]  ;;  %1908 = vmatprep.subr.bf16.mxu1 %v2078_v0  ;;  %v321_v54 = vld [vmem:[#allocation2 + $0x29] sm:$0xff]  ;;  %1882 = vmatpush3.bf16.msra.mxu0 %v1881_v57 }
 0x12c   :  { %v311_v53 = vld [vmem:[#allocation2 + $0x27] sm:$0xff]  ;;  %1609 = vmatmul.mubr.f32.gmra.mrb[16].mxu1 %v320_v52  ;;  %1884 = vmatprep.subr.bf16.mxu0 %v1883_v60 }
 0x12d   :  { %463 = vmatmul.mubr.f32.gmra.mrb[18].mxu0 %v311_v53  ;;  %1611 = vmatprep.mubr.msk.f32.mxu1 %vm2080_vm0, %v2079_v1  ;;  %v840_v60 = vld [vmem:[#allocation3 + $0x488] sm:$0xff] }
 0x12e   :  { %1910 = vmatpush3.bf16.msra.mxu1 %v1909_v2  ;;  %v858_v2 = vld [vmem:[#allocation3 + $0x518] sm:$0xff] }
 0x12f   :  { %1886 = vmatpush3.bf16.msra.mxu0 %v1885_v4  ;;  %1911 = vmatprep.subr.bf16.mxu1 %v2078_v0  ;;  %v1925_v4 = vpack.c.bf16 %v840_v60, %v839_v59  ;;  %v1927_v8 = vpack.c.bf16 %v858_v2, %v857_v63  ;;  %v848_v60 = vld [vmem:[#allocation3 + $0x4c8] sm:$0xff]  ;;  %v866_v63 = vld [vmem:[#allocation3 + $0x558] sm:$0xff] }
 0x130   :  { %1612 = vmatmul.mubr.f32.gmra.mrb[18].mxu1 %v321_v54  ;;  %1888 = vmatprep.subr.bf16.mxu0 %v1887_v7 }
 0x131   :  { %1646 = vmatprep.mubr.msk.f32.mxu1 %vm2080_vm0, %v2079_v1 }
 0x132   :  { %1913 = vmatpush3.bf16.msra.mxu1 %v1912_v11 }
 0x133   :  { %1890 = vmatpush3.bf16.msra.mxu0 %v1889_v13  ;;  %1914 = vmatprep.subr.bf16.mxu1 %v2078_v0 }
 0x134   :  { %1892 = vmatprep.subr.bf16.mxu0 %v1891_v16 }
 0x136   :  { %1916 = vmatpush3.bf16.msra.mxu1 %v1915_v20 }
 0x137   :  { %1894 = vmatpush3.bf16.msra.mxu0 %v1893_v22  ;;  %1917 = vmatprep.subr.bf16.mxu1 %v2078_v0 }
 0x138   :  { %1896 = vmatprep.subr.bf16.mxu0 %v1895_v25  ;;  %v873_v25 = vld [vmem:[#allocation3 + $0x590] sm:$0xff] }
 0x13a   :  { %1919 = vmatpush3.bf16.msra.mxu1 %v1918_v29 }
 0x13b   :  { %1898 = vmatpush3.bf16.msra.mxu0 %v1897_v31  ;;  %1920 = vmatprep.subr.bf16.mxu1 %v2078_v0  ;;  %v1931_v31 = vpack.c.bf16 %v860_v19, %v859_v18  ;;  %v869_v18 = vld [vmem:[#allocation3 + $0x570] sm:$0xff]  ;;  %v870_v19 = vld [vmem:[#allocation3 + $0x578] sm:$0xff] }
 0x13c   :  { %1924 = vmatprep.subr.bf16.mxu0 %v1923_v37  ;;  %v1959_v37 = vpack.c.bf16 %v874_v26, %v873_v25  ;;  %v854_v25 = vld [vmem:[#allocation3 + $0x4f8] sm:$0xff] }
 0x13e   :  { %1922 = vmatpush3.bf16.msra.mxu1 %v1921_v34  ;;  %v861_v34 = vld [vmem:[#allocation3 + $0x530] sm:$0xff] }
 0x13f   :  { %1955 = vmatprep.subr.bf16.mxu1 %v2078_v0 }
 0x1ef   :  { %v1327_v38 = vpop.f32.mrb[10].mxu0 }
 0x1f0   :  { %v1328_v39 = vpop.f32.mrb[11].mxu0 }
 0x1f1   :  { %v1329_v41 = vadd.f32 %v1328_v39, %v1327_v38  ;;  %v1933_v38 = vpack.c.bf16 %v844_v32, %v843_v27  ;;  %v875_v39 = vld [vmem:[#allocation3 + $0x5a0] sm:$0xff]  ;;  %v885_v27 = vld [vmem:[#allocation3 + $0x5f0] sm:$0xff]  ;;  %v1222_v32 = vld [vmem:[%s2343_s2 + $0x2] ss:$0 sm:$0xff] }
 0x1f3   :  { %v446_v42 = vadd.f32 %v1329_v41, %v1220_v40  ;;  %v534_v43 = vpop.f32.mrb[10].mxu1 }
 0x1f4   :  { %v1330_v44 = vpop.f32.mrb[12].mxu0  ;;  %v1601_v45 = vpop.f32.mrb[11].mxu1 }
 0x1f5   :  { %v1331_v46 = vpop.f32.mrb[13].mxu0  ;;  %v535_v47 = vadd.f32 %v534_v43, %v446_v42  ;;  %v1935_v42 = vpack.c.bf16 %v862_v35, %v861_v34  ;;  %v876_v43 = vld [vmem:[#allocation3 + $0x5a8] sm:$0xff] }
 0x1f6   :  { %v1332_v48 = vadd.f32 %v1331_v46, %v1330_v44  ;;  %v2209_v44 = vld [vmem:[#allocation2] sm:$0xff] }
 0x1f7   :  { %v557_v49 = vmax.f32 %v535_v47, 0.0  ;;  %v539_v51 = vpop.f32.mrb[12].mxu1 }
 0x1f8   :  { %v451_v50 = vadd.f32 %v1332_v48, %v1220_v40  ;;  %v1333_v52 = vpop.f32.mrb[14].mxu0  ;;  %v1604_v53 = vpop.f32.mrb[13].mxu1 }
 0x1f9   :  { %v1334_v54 = vpop.f32.mrb[15].mxu0  ;;  %561 = vst [vmem:[#allocation2 + $0x8] sm:$0xff] %v557_v49  ;;  %701 = vmatprep.mubr.f32.mxu0 %v557_v49  ;;  %v863_v53 = vld [vmem:[#allocation3 + $0x540] sm:$0xff] }
 0x1fa   :  { %v540_v55 = vadd.f32 %v539_v51, %v451_v50  ;;  %v845_v50 = vld [vmem:[#allocation3 + $0x4b0] sm:$0xff]  ;;  %v846_v51 = vld [vmem:[#allocation3 + $0x4b8] sm:$0xff]  ;;  %v864_v54 = vld [vmem:[#allocation3 + $0x548] sm:$0xff] }
 0x1fb   :  { %v544_v57 = vpop.f32.mrb[14].mxu1  ;;  %v1937_v52 = vpack.c.bf16 %v846_v51, %v845_v50  ;;  %v1080_v51 = vld [vmem:[%s2344_s3] sm:$0xff] }
 0x1fc   :  { %v558_v56 = vmax.f32 %v540_v55, 0.0  ;;  %v1336_v58 = vpop.f32.mrb[16].mxu0  ;;  %v1607_v61 = vpop.f32.mrb[15].mxu1  ;;  %v1939_v55 = vpack.c.bf16 %v864_v54, %v863_v53  ;;  %v878_v57 = vld [vmem:[#allocation3 + $0x5b8] sm:$0xff] }
 0x1fd   :  { %v1337_v62 = vpop.f32.mrb[17].mxu0 }
 0x1fe   :  { %562 = vst [vmem:[#allocation2 + $0x10] sm:$0xff] %v558_v56  ;;  %v1338_v3 = vadd.f32 %v1337_v62, %v1336_v58  ;;  %v847_v58 = vld [vmem:[#allocation3 + $0x4c0] sm:$0xff]  ;;  %v865_v62 = vld [vmem:[#allocation3 + $0x550] sm:$0xff] }
 0x1ff   :  { %v548_v6 = vpop.f32.mrb[16].mxu1  ;;  %v1941_v61 = vpack.c.bf16 %v848_v60, %v847_v58  ;;  %v1943_v2 = vpack.c.bf16 %v866_v63, %v865_v62  ;;  %v1082_v63 = vld [vmem:[%s2344_s3 + $0x10] sm:$0xff] }
 0x200   :  { %v460_v5 = vadd.f32 %v1338_v3, %v1220_v40  ;;  %v1339_v7 = vpop.f32.mrb[18].mxu0  ;;  %v1610_v11 = vpop.f32.mrb[17].mxu1  ;;  %v565_v13 = vld [vmem:[#allocation2 + $0x7] sm:$0xff]  ;;  %v879_v3 = vld [vmem:[#allocation3 + $0x5c0] sm:$0xff] }
 0x201   :  { %v1340_v12 = vpop.f32.mrb[19].mxu0  ;;  %702 = vmatmul.mubr.f32.vlgmr.msra.gmra.mrb[20].mxu0 %v565_v13  ;;  %v1947_v11 = vpack.c.bf16 %v868_v10, %v867_v9  ;;  %v882_v13 = vld [vmem:[#allocation3 + $0x5d8] sm:$0xff]  ;;  %v1084_v9 = vld [vmem:[%s2344_s3 + $0x20] sm:$0xff] }
 0x202   :  { %v549_v16 = vadd.f32 %v548_v6, %v460_v5  ;;  %v1341_v17 = vadd.f32 %v1340_v12, %v1339_v7  ;;  %706 = vmatprep.mubr.f32.mxu0 %v558_v56  ;;  %1926 = vmatpush3.bf16.msra.mxu0 %v1925_v4  ;;  %v877_v56 = vld [vmem:[#allocation3 + $0x5b0] sm:$0xff]  ;;  %v880_v4 = vld [vmem:[#allocation3 + $0x5c8] sm:$0xff]  ;;  %v850_v7 = vld [vmem:[#allocation3 + $0x4d8] sm:$0xff] }
 0x203   :  { %v553_v22 = vpop.f32.mrb[18].mxu1  ;;  %1928 = vmatprep.subr.bf16.mxu0 %v1927_v8  ;;  %v1965_v59 = vpack.c.bf16 %v878_v57, %v877_v56  ;;  %v849_v5 = vld [vmem:[#allocation3 + $0x4d0] sm:$0xff]  ;;  %v1968_v6 = vpack.c.bf16 %v880_v4, %v879_v3 }
 0x204   :  { %v559_v20 = vmax.f32 %v549_v16, 0.0  ;;  %v465_v21 = vadd.f32 %v1341_v17, %v1220_v40  ;;  %v1613_v28 = vpop.f32.mrb[19].mxu1  ;;  %v1945_v8 = vpack.c.bf16 %v850_v7, %v849_v5  ;;  %v881_v12 = vld [vmem:[#allocation3 + $0x5d0] sm:$0xff]  ;;  %v852_v16 = vld [vmem:[#allocation3 + $0x4e8] sm:$0xff] }
 0x205   :  { %v575_v29 = vld [vmem:[#allocation2 + $0x9] sm:$0xff]  ;;  %v576_v40 = vld [vmem:[#allocation2 + $0x11] sm:$0xff]  ;;  %v1971_v15 = vpack.c.bf16 %v882_v13, %v881_v12  ;;  %v1949_v17 = vpack.c.bf16 %v852_v16, %v851_v14 }
 0x206   :  { %v566_v30 = vld [vmem:[#allocation2 + $0xf] sm:$0xff]  ;;  %563 = vst [vmem:[#allocation2 + $0x20] sm:$0xff] %v559_v20  ;;  %v554_v33 = vadd.f32 %v553_v22, %v465_v21  ;;  %1647 = vmatmul.mubr.f32.vlgmr.msra.gmra.mrb[20].mxu1 %v575_v29  ;;  %1930 = vmatpush3.bf16.msra.mxu0 %v1929_v24  ;;  %v567_v41 = vld [vmem:[#allocation2 + $0x17] sm:$0xff]  ;;  %v884_v22 = vld [vmem:[#allocation3 + $0x5e8] sm:$0xff] }
 0x207   :  { %707 = vmatmul.mubr.f32.gmra.mrb[22].mxu0 %v566_v30  ;;  %1649 = vmatprep.mubr.msk.f32.mxu1 %vm2080_vm0, %v2079_v1  ;;  %v883_v21 = vld [vmem:[#allocation3 + $0x5e0] sm:$0xff]  ;;  %v886_v28 = vld [vmem:[#allocation3 + $0x5f8] sm:$0xff]  ;;  %v1085_v13 = vld [vmem:[%s2344_s3 + $0x28] sm:$0xff] }
 0x208   :  { %711 = vmatprep.mubr.f32.mxu0 %v2079_v1  ;;  %v560_v36 = vmax.f32 %v554_v33, 0.0  ;;  %1957 = vmatpush3.bf16.msra.mxu1 %v1956_v23  ;;  %v1962_v1 = vpack.c.bf16 %v876_v43, %v875_v39  ;;  %v853_v23 = vld [vmem:[#allocation3 + $0x4f0] sm:$0xff]  ;;  %v1974_v24 = vpack.c.bf16 %v884_v22, %v883_v21  ;;  %v1977_v29 = vpack.c.bf16 %v886_v28, %v885_v27  ;;  %v1088_v22 = vld [vmem:[%s2344_s3 + $0x40] sm:$0xff]  ;;  %v1090_v27 = vld [vmem:[%s2344_s3 + $0x50] sm:$0xff] }
 0x209   :  { %1958 = vmatprep.subr.bf16.mxu1 %v2078_v0  ;;  %1932 = vmatprep.subr.bf16.mxu0 %v1931_v31  ;;  %v1953_v26 = vpack.c.bf16 %v854_v25, %v853_v23  ;;  %v1986_v16 = vpack.c.bf16 %v1085_v13, %v1084_v9  ;;  %v1089_v25 = vld [vmem:[%s2344_s3 + $0x48] sm:$0xff] }
 0x20a   :  { %564 = vst [vmem:[#allocation2 + $0x28] sm:$0xff] %v560_v36  ;;  %1650 = vmatmul.mubr.f32.gmra.mrb[22].mxu1 %v576_v40  ;;  %1934 = vmatpush3.bf16.msra.mxu0 %v1933_v38 }
 0x20b   :  { %712 = vmatmul.mubr.f32.gmra.mrb[24].mxu0 %v567_v41  ;;  %1652 = vmatprep.mubr.msk.f32.mxu1 %vm2080_vm0, %v2209_v44 }
 0x20c   :  { %715 = vmatprep.mubr.f32.mxu0 %v559_v20  ;;  %1960 = vmatpush3.bf16.msra.mxu1 %v1959_v37  ;;  %v1951_v20 = vpack.c.bf16 %v870_v19, %v869_v18 }
 0x20d   :  { %v577_v45 = vld [vmem:[#allocation2 + $0x19] sm:$0xff]  ;;  %1961 = vmatprep.subr.bf16.mxu1 %v2078_v0  ;;  %1936 = vmatprep.subr.bf16.mxu0 %v1935_v42 }
 0x20e   :  { %v568_v46 = vld [vmem:[#allocation2 + $0x1f] sm:$0xff]  ;;  %1653 = vmatmul.mubr.f32.gmra.mrb[24].mxu1 %v577_v45  ;;  %1938 = vmatpush3.bf16.msra.mxu0 %v1937_v52  ;;  %v1081_v52 = vld [vmem:[%s2344_s3 + $0x8] sm:$0xff] }
 0x20f   :  { %716 = vmatmul.mubr.f32.gmra.mrb[26].mxu0 %v568_v46  ;;  %1655 = vmatprep.mubr.msk.f32.mxu1 %vm2080_vm0, %v2209_v44  ;;  %v1980_v56 = vpack.c.bf16 %v1081_v52, %v1080_v51 }
 0x210   :  { %720 = vmatprep.mubr.f32.mxu0 %v560_v36  ;;  %1963 = vmatpush3.bf16.msra.mxu1 %v1962_v1 }
 0x211   :  { %v578_v47 = vld [vmem:[#allocation2 + $0x21] sm:$0xff]  ;;  %1964 = vmatprep.subr.bf16.mxu1 %v2078_v0  ;;  %v579_v49 = vld [vmem:[#allocation2 + $0x29] sm:$0xff]  ;;  %1940 = vmatprep.subr.bf16.mxu0 %v1939_v55 }
 0x212   :  { %v569_v48 = vld [vmem:[#allocation2 + $0x27] sm:$0xff]  ;;  %1656 = vmatmul.mubr.f32.gmra.mrb[26].mxu1 %v578_v47  ;;  %1942 = vmatpush3.bf16.msra.mxu0 %v1941_v61 }
 0x213   :  { %721 = vmatmul.mubr.f32.gmra.mrb[28].mxu0 %v569_v48  ;;  %1658 = vmatprep.mubr.msk.f32.mxu1 %vm2080_vm0, %v2209_v44 }
 0x214   :  { %1966 = vmatpush3.bf16.msra.mxu1 %v1965_v59  ;;  %1944 = vmatprep.subr.bf16.mxu0 %v1943_v2  ;;  %v1083_v2 = vld [vmem:[%s2344_s3 + $0x18] sm:$0xff] }
 0x215   :  { %1967 = vmatprep.subr.bf16.mxu1 %v2078_v0 }
 0x216   :  { %1659 = vmatmul.mubr.f32.gmra.mrb[28].mxu1 %v579_v49  ;;  %1946 = vmatpush3.bf16.msra.mxu0 %v1945_v8  ;;  %v1983_v8 = vpack.c.bf16 %v1083_v2, %v1082_v63 }
 0x217   :  { %1693 = vmatprep.mubr.msk.f32.mxu1 %vm2080_vm0, %v2209_v44  ;;  %1948 = vmatprep.subr.bf16.mxu0 %v1947_v11 }
 0x218   :  { %1969 = vmatpush3.bf16.msra.mxu1 %v1968_v6 }
 0x219   :  { %1970 = vmatprep.subr.bf16.mxu1 %v2078_v0 }
 0x21a   :  { %1950 = vmatpush3.bf16.msra.mxu0 %v1949_v17  ;;  %v1086_v17 = vld [vmem:[%s2344_s3 + $0x30] sm:$0xff] }
 0x21b   :  { %1952 = vmatprep.subr.bf16.mxu0 %v1951_v20  ;;  %v1087_v20 = vld [vmem:[%s2344_s3 + $0x38] sm:$0xff] }
 0x21c   :  { %1972 = vmatpush3.bf16.msra.mxu1 %v1971_v15  ;;  %v1989_v21 = vpack.c.bf16 %v1087_v20, %v1086_v17 }
 0x21d   :  { %1973 = vmatprep.subr.bf16.mxu1 %v2078_v0 }
 0x21e   :  { %1954 = vmatpush3.bf16.msra.mxu0 %v1953_v26  ;;  %v1992_v26 = vpack.c.bf16 %v1089_v25, %v1088_v22 }
 0x21f   :  { %1979 = vmatprep.subr.bf16.mxu0 %v2078_v0 }
 0x220   :  { %1975 = vmatpush3.bf16.msra.mxu1 %v1974_v24 }
 0x221   :  { %1976 = vmatprep.subr.bf16.mxu1 %v2078_v0 }
 0x224   :  { %1978 = vmatpush3.bf16.msra.mxu1 %v1977_v29 }
 0x225   :  { %2003 = vmatprep.subr.bf16.mxu1 %v2078_v0 }
 0x2d4   :  { %v1395_v30 = vpop.f32.mrb[20].mxu0 }
 0x2d5   :  { %v1396_v31 = vpop.f32.mrb[21].mxu0 }
 0x2d6   :  { %v1397_v33 = vadd.f32 %v1396_v31, %v1395_v30  ;;  %v1091_v30 = vld [vmem:[%s2344_s3 + $0x58] sm:$0xff] }
 0x2d7   :  { %v1995_v31 = vpack.c.bf16 %v1091_v30, %v1090_v27 }
 0x2d8   :  { %v704_v34 = vadd.f32 %v1397_v33, %v1222_v32  ;;  %v1092_v33 = vld [vmem:[%s2344_s3 + $0x60] sm:$0xff] }
 0x2d9   :  { %v792_v35 = vpop.f32.mrb[20].mxu1 }
 0x2da   :  { %v1398_v36 = vpop.f32.mrb[22].mxu0  ;;  %v1648_v37 = vpop.f32.mrb[21].mxu1  ;;  %v793_v39 = vadd.f32 %v792_v35, %v704_v34  ;;  %v1093_v34 = vld [vmem:[%s2344_s3 + $0x68] sm:$0xff] }
 0x2db   :  { %v1399_v38 = vpop.f32.mrb[23].mxu0  ;;  %v1998_v35 = vpack.c.bf16 %v1093_v34, %v1092_v33  ;;  %v1095_v37 = vld [vmem:[%s2344_s3 + $0x78] sm:$0xff] }
 0x2dc   :  { %v1400_v40 = vadd.f32 %v1399_v38, %v1398_v36  ;;  %v815_v41 = vmax.f32 %v793_v39, 0.0  ;;  %v1094_v36 = vld [vmem:[%s2344_s3 + $0x70] sm:$0xff] }
 0x2dd   :  { %v797_v43 = vpop.f32.mrb[22].mxu1  ;;  %v2001_v38 = vpack.c.bf16 %v1095_v37, %v1094_v36 }
 0x2de   :  { %v709_v42 = vadd.f32 %v1400_v40, %v1222_v32  ;;  %v1401_v1 = vpop.f32.mrb[24].mxu0  ;;  %v1651_v45 = vpop.f32.mrb[23].mxu1  ;;  %819 = vst [vmem:[#allocation2 + $0x8] sm:$0xff] %v815_v41  ;;  %959 = vmatprep.mubr.f32.mxu0 %v815_v41  ;;  %v1224_v41 = vld [vmem:[%s2343_s2 + $0x3] ss:$0 sm:$0xff] }
 0x2df   :  { %v1402_v46 = vpop.f32.mrb[25].mxu0 }
 0x2e0   :  { %v798_v47 = vadd.f32 %v797_v43, %v709_v42 }
 0x2e1   :  { %v802_v49 = vpop.f32.mrb[24].mxu1 }
 0x2e2   :  { %v816_v48 = vmax.f32 %v798_v47, 0.0  ;;  %v1404_v50 = vpop.f32.mrb[26].mxu0  ;;  %v1654_v53 = vpop.f32.mrb[25].mxu1 }
 0x2e3   :  { %v1405_v54 = vpop.f32.mrb[27].mxu0 }
 0x2e4   :  { %820 = vst [vmem:[#allocation2 + $0x10] sm:$0xff] %v816_v48  ;;  %v1406_v55 = vadd.f32 %v1405_v54, %v1404_v50 }
 0x2e5   :  { %v806_v58 = vpop.f32.mrb[26].mxu1  ;;  %v823_v62 = vld [vmem:[#allocation2 + $0x7] sm:$0xff] }
 0x2e6   :  { %v718_v57 = vadd.f32 %v1406_v55, %v1222_v32  ;;  %v1407_v59 = vpop.f32.mrb[28].mxu0  ;;  %v1657_v60 = vpop.f32.mrb[27].mxu1  ;;  %960 = vmatmul.mubr.f32.vlgmr.msra.gmra.mrb[30].mxu0 %v823_v62 }
 0x2e7   :  { %v1408_v61 = vpop.f32.mrb[29].mxu0  ;;  %964 = vmatprep.mubr.f32.mxu0 %v816_v48  ;;  %1981 = vmatpush3.bf16.msra.mxu0 %v1980_v56 }
 0x2e8   :  { %v807_v3 = vadd.f32 %v806_v58, %v718_v57  ;;  %v1409_v4 = vadd.f32 %v1408_v61, %v1407_v59  ;;  %1982 = vmatprep.subr.bf16.mxu0 %v2078_v0 }
 0x2e9   :  { %v811_v7 = vpop.f32.mrb[28].mxu1 }
 0x2ea   :  { %v817_v5 = vmax.f32 %v807_v3, 0.0  ;;  %v723_v6 = vadd.f32 %v1409_v4, %v1222_v32  ;;  %v1660_v10 = vpop.f32.mrb[29].mxu1 }
 0x2eb   :  { %v833_v11 = vld [vmem:[#allocation2 + $0x9] sm:$0xff]  ;;  %1984 = vmatpush3.bf16.msra.mxu0 %v1983_v8  ;;  %v834_v18 = vld [vmem:[#allocation2 + $0x11] sm:$0xff] }
 0x2ec   :  { %v824_v12 = vld [vmem:[#allocation2 + $0xf] sm:$0xff]  ;;  %821 = vst [vmem:[#allocation2 + $0x20] sm:$0xff] %v817_v5  ;;  %v812_v14 = vadd.f32 %v811_v7, %v723_v6  ;;  %1694 = vmatmul.mubr.f32.vlgmr.msra.gmra.mrb[30].mxu1 %v833_v11  ;;  %v825_v19 = vld [vmem:[#allocation2 + $0x17] sm:$0xff]  ;;  %1985 = vmatprep.subr.bf16.mxu0 %v2078_v0 }
 0x2ed   :  { %965 = vmatmul.mubr.f32.gmra.mrb[32].mxu0 %v824_v12  ;;  %1696 = vmatprep.mubr.msk.f32.mxu1 %vm2080_vm0, %v2209_v44 }
 0x2ee   :  { %969 = vmatprep.mubr.f32.mxu0 %v2209_v44  ;;  %v818_v15 = vmax.f32 %v812_v14, 0.0  ;;  %2011 = vmatpush3.bf16.msra.mxu1 %v1980_v56 }
 0x2ef   :  { %2004 = vmatprep.subr.bf16.mxu1 %v2078_v0  ;;  %1987 = vmatpush3.bf16.msra.mxu0 %v1986_v16 }
 0x2f0   :  { %822 = vst [vmem:[#allocation2 + $0x28] sm:$0xff] %v818_v15  ;;  %1697 = vmatmul.mubr.f32.gmra.mrb[32].mxu1 %v834_v18  ;;  %1988 = vmatprep.subr.bf16.mxu0 %v2078_v0 }
 0x2f1   :  { %970 = vmatmul.mubr.f32.gmra.mrb[34].mxu0 %v825_v19  ;;  %1699 = vmatprep.mubr.msk.f32.mxu1 %vm2080_vm0, %v2209_v44 }
 0x2f2   :  { %974 = vmatprep.mubr.f32.mxu0 %v817_v5  ;;  %2012 = vmatpush3.bf16.msra.mxu1 %v1983_v8 }
 0x2f3   :  { %v835_v23 = vld [vmem:[#allocation2 + $0x19] sm:$0xff]  ;;  %2005 = vmatprep.subr.bf16.mxu1 %v2078_v0  ;;  %1990 = vmatpush3.bf16.msra.mxu0 %v1989_v21 }
 0x2f4   :  { %v826_v24 = vld [vmem:[#allocation2 + $0x1f] sm:$0xff]  ;;  %1700 = vmatmul.mubr.f32.gmra.mrb[34].mxu1 %v835_v23  ;;  %1991 = vmatprep.subr.bf16.mxu0 %v2078_v0 }
 0x2f5   :  { %975 = vmatmul.mubr.f32.gmra.mrb[36].mxu0 %v826_v24  ;;  %1702 = vmatprep.mubr.msk.f32.mxu1 %vm2080_vm0, %v2209_v44 }
 0x2f6   :  { %979 = vmatprep.mubr.f32.mxu0 %v818_v15  ;;  %2013 = vmatpush3.bf16.msra.mxu1 %v1986_v16 }
 0x2f7   :  { %v836_v28 = vld [vmem:[#allocation2 + $0x21] sm:$0xff]  ;;  %2006 = vmatprep.subr.bf16.mxu1 %v2078_v0  ;;  %1993 = vmatpush3.bf16.msra.mxu0 %v1992_v26  ;;  %v837_v32 = vld [vmem:[#allocation2 + $0x29] sm:$0xff] }
 0x2f8   :  { %v827_v29 = vld [vmem:[#allocation2 + $0x27] sm:$0xff]  ;;  %1703 = vmatmul.mubr.f32.gmra.mrb[36].mxu1 %v836_v28  ;;  %1994 = vmatprep.subr.bf16.mxu0 %v2078_v0 }
 0x2f9   :  { %980 = vmatmul.mubr.f32.gmra.mrb[38].mxu0 %v827_v29  ;;  %1705 = vmatprep.mubr.msk.f32.mxu1 %vm2080_vm0, %v2209_v44 }
 0x2fa   :  { %1740 = vmatprep.mubr.msk.f32.mxu0 %vm2080_vm0, %v2209_v44  ;;  %2014 = vmatpush3.bf16.msra.mxu1 %v1989_v21 }
 0x2fb   :  { %2007 = vmatprep.subr.bf16.mxu1 %v2078_v0  ;;  %1996 = vmatpush3.bf16.msra.mxu0 %v1995_v31 }
 0x2fc   :  { %1706 = vmatmul.mubr.f32.gmra.mrb[38].mxu1 %v837_v32  ;;  %1997 = vmatprep.subr.bf16.mxu0 %v2078_v0 }
 0x2fd   :  { %1749 = vmatprep.mubr.msk.f32.mxu1 %vm2080_vm0, %v2209_v44 }
 0x2fe   :  { %2015 = vmatpush3.bf16.msra.mxu1 %v1992_v26 }
 0x2ff   :  { %2008 = vmatprep.subr.bf16.mxu1 %v2078_v0  ;;  %1999 = vmatpush3.bf16.msra.mxu0 %v1998_v35 }
 0x300   :  { %2000 = vmatprep.subr.bf16.mxu0 %v2078_v0 }
 0x302   :  { %2016 = vmatpush3.bf16.msra.mxu1 %v1995_v31 }
 0x303   :  { %2009 = vmatprep.subr.bf16.mxu1 %v2078_v0  ;;  %2002 = vmatpush3.bf16.msra.mxu0 %v2001_v38 }
 0x306   :  { %2017 = vmatpush3.bf16.msra.mxu1 %v1998_v35 }
 0x307   :  { %2010 = vmatprep.subr.bf16.mxu1 %v2078_v0 }
 0x30a   :  { %2018 = vmatpush3.bf16.msra.mxu1 %v2001_v38 }
 0x3b9   :  { %v1463_v39 = vpop.f32.mrb[30].mxu0 }
 0x3ba   :  { %v1464_v40 = vpop.f32.mrb[31].mxu0 }
 0x3bb   :  { %v1465_v42 = vadd.f32 %v1464_v40, %v1463_v39 }
 0x3bd   :  { %v962_v43 = vadd.f32 %v1465_v42, %v1224_v41 }
 0x3bf   :  { %v1051_v1 = vpop.f32.mrb[30].mxu1 }
 0x3c0   :  { %v1466_v45 = vpop.f32.mrb[32].mxu0  ;;  %v1695_v46 = vpop.f32.mrb[31].mxu1  ;;  %v1052_v48 = vadd.f32 %v1051_v1, %v962_v43 }
 0x3c1   :  { %v1467_v47 = vpop.f32.mrb[33].mxu0 }
 0x3c2   :  { %v1468_v49 = vadd.f32 %v1467_v47, %v1466_v45  ;;  %v1075_v50 = vmax.f32 %v1052_v48, 0.0 }
 0x3c3   :  { %v1056_v0 = vpop.f32.mrb[32].mxu1 }
 0x3c4   :  { %v967_v51 = vadd.f32 %v1468_v49, %v1224_v41  ;;  %v1469_v52 = vpop.f32.mrb[34].mxu0  ;;  %v1698_v53 = vpop.f32.mrb[33].mxu1  ;;  %1185 = vst [vmem:[%s2345_s4] sm:$0xff] %v1075_v50  ;;  %1741 = vmatmul.mubr.f32.vlgmr.msra.gmra.mrb[40].mxu0 %v1075_v50 }
 0x3c5   :  { %v1470_v54 = vpop.f32.mrb[35].mxu0  ;;  %1743 = vmatprep.mubr.msk.f32.mxu0 %vm2080_vm0, %v2209_v44 }
 0x3c6   :  { %v1057_v55 = vadd.f32 %v1056_v0, %v967_v51  ;;  %v1471_v56 = vadd.f32 %v1470_v54, %v1469_v52 }
 0x3c7   :  { %v1061_v59 = vpop.f32.mrb[34].mxu1 }
 0x3c8   :  { %v1076_v57 = vmax.f32 %v1057_v55, 0.0  ;;  %v972_v58 = vadd.f32 %v1471_v56, %v1224_v41  ;;  %v1472_v60 = vpop.f32.mrb[36].mxu0  ;;  %v1701_v61 = vpop.f32.mrb[35].mxu1 }
 0x3c9   :  { %v1473_v62 = vpop.f32.mrb[37].mxu0 }
 0x3ca   :  { %1186 = vst [vmem:[%s2345_s4 + $0x8] sm:$0xff] %v1076_v57  ;;  %v1062_v63 = vadd.f32 %v1061_v59, %v972_v58  ;;  %v1474_v2 = vadd.f32 %v1473_v62, %v1472_v60  ;;  %1744 = vmatmul.mubr.f32.gmra.mrb[42].mxu0 %v1076_v57 }
 0x3cb   :  { %1746 = vmatprep.mubr.msk.f32.mxu0 %vm2080_vm0, %v2209_v44  ;;  %v1066_v5 = vpop.f32.mrb[36].mxu1 }
 0x3cc   :  { %v1077_v3 = vmax.f32 %v1062_v63, 0.0  ;;  %v977_v4 = vadd.f32 %v1474_v2, %v1224_v41  ;;  %v1475_v6 = vpop.f32.mrb[38].mxu0  ;;  %v1704_v7 = vpop.f32.mrb[37].mxu1 }
 0x3cd   :  { %v1476_v8 = vpop.f32.mrb[39].mxu0 }
 0x3ce   :  { %v1067_v9 = vadd.f32 %v1066_v5, %v977_v4  ;;  %v1477_v10 = vadd.f32 %v1476_v8, %v1475_v6  ;;  %1747 = vmatmul.mubr.f32.gmra.mrb[44].mxu0 %v1077_v3 }
 0x3cf   :  { %v1071_v13 = vpop.f32.mrb[38].mxu1 }
 0x3d0   :  { %v1078_v11 = vmax.f32 %v1067_v9, 0.0  ;;  %v982_v12 = vadd.f32 %v1477_v10, %v1224_v41  ;;  %v1707_v14 = vpop.f32.mrb[39].mxu1 }
 0x3d2   :  { %1225 = vst [vmem:[%s2345_s4 + $0x10] sm:$0xff] %v1078_v11  ;;  %v1072_v15 = vadd.f32 %v1071_v13, %v982_v12  ;;  %1750 = vmatmul.mubr.f32.vlgmr.msra.gmra.mrb[40].mxu1 %v1078_v11 }
 0x3d3   :  { %1752 = vmatprep.mubr.msk.f32.mxu1 %vm2080_vm0, %v2209_v44 }
 0x3d4   :  { %v1079_v16 = vmax.f32 %v1072_v15, 0.0 }
 0x3d6   :  { %1226 = vst [vmem:[%s2345_s4 + $0x18] sm:$0xff] %v1079_v16  ;;  %1753 = vmatmul.mubr.f32.gmra.mrb[42].mxu1 %v1079_v16 }
 0x497   :  { %v1162_v17 = vpop.f32.mrb[40].mxu0 }
 0x498   :  { %1187 = vst [vmem:[#allocation6] sm:$0xff] %v1162_v17  ;;  %v1742_v18 = vpop.f32.mrb[41].mxu0 }
 0x49d   :  { %v1167_v19 = vpop.f32.mrb[42].mxu0 }
 0x49e   :  { %1188 = vst [vmem:[#allocation6 + $0x8] sm:$0xff] %v1167_v19  ;;  %v1745_v20 = vpop.f32.mrb[43].mxu0 }
 0x4a1   :  { %v1172_v21 = vpop.f32.mrb[44].mxu0 }
 0x4a2   :  { %v1748_v22 = vpop.f32.mrb[45].mxu0 }
 0x4a5   :  { %v1176_v23 = vpop.f32.mrb[40].mxu1 }
 0x4a6   :  { %1193 = vst [vmem:[#allocation6 + $0x10] sm:$0xff] %v1176_v23  ;;  %v1751_v24 = vpop.f32.mrb[41].mxu1 }
 0x4a9   :  { %v1181_v44 = vpop.f32.mrb[42].mxu1 }
 0x4aa   :  { %1194 = vst [vmem:[#allocation6 + $0x18] sm:$0xff] %v1181_v44  ;;  %v1754_v25 = vpop.f32.mrb[43].mxu1 }
 0x4ab   :  { %2060 = shalt.err (!%p2057_p12)
}
 0x4ac   :  { %s2061_s0 = scalar_lea.hbm %s2346_s5, 512 }
 0x4ad   :  { %p2062_p13 = scmp.ne.s32.totalorder %s2346_s5, %s2061_s0  ;;  %p2065_p0 = scmp.lt.u32.totalorder %s2061_s0, %s2346_s5 }
 0x4af   :  { %p2067_p1 = pnand %p2065_p0, %p2062_p13 }
 0x4b1   :  { %2070 = shalt.err (!%p2067_p1)
}
 0x4b2   :  { %1208 = dma.vmem_to_hbm [thread:$0]  %s1203_s11, 512, %s2346_s5, [#allocation5], %s2076_s28, %s2076_s28, %s2077_s29  }
 0x4b3   :  { %2073 = dma.done.wait [#allocation5], 512  }
 0x4b4   :  { %2074 = vsyncadd [#allocation5], 4294966784 }
 0x4b5   :  { %1214 = vsyncpa [#allocation4], 1 }
 0x4b6   :  { %1215 = vsyncpa [#allocation5], 1 }

</bundles_post_ra>
